<compile_context>
chip_gen: v7x
topology: tpu7x:2x2x1
jax: 0.10.0
libtpu: 0.0.40
codegen_flags: <defaults>
</compile_context>

<pallas_src>
import jax
import jax.numpy as jnp
from jax import lax
from jax.experimental import pallas as pl
from jax.experimental.pallas import tpu as pltpu


NEG_SLOPE = 0.01  # nn.LeakyReLU() default negative_slope


def fogpass_mlp_kernel(x_ref, w1_ref, b1_ref, w2_ref, b2_ref, o_ref):
    # x_ref:  (block_f, fold*D)     -- `fold` original rows packed per folded row
    # w1_ref: (fold*D, fold*H)      -- block-diagonal replicas of W1^T (resident)
    # b1_ref: (1, fold*H)
    # w2_ref: (fold*H, fold*64)     -- block-diagonal replicas of W2^T (resident)
    # b2_ref: (1, fold*64)
    # o_ref:  (block_f, fold*64)    -- lane-dense store (multiple of 128 lanes)
    h = jnp.dot(x_ref[...], w1_ref[...],
                preferred_element_type=jnp.float32,
                precision=lax.Precision.HIGHEST)
    h = h + b1_ref[...]
    h = jnp.where(h > 0.0, h, NEG_SLOPE * h)          # LeakyReLU(0.01)
    y = jnp.dot(h, w2_ref[...],
                preferred_element_type=jnp.float32,
                precision=lax.Precision.HIGHEST)
    o_ref[...] = (y + b2_ref[...]).astype(o_ref.dtype)


def _round_up(n, m):
    return ((n + m - 1) // m) * m


def _tpu_defaults():
    """Return (target x-tile bytes, fold factor) for the local TPU generation."""
    kind = ""
    try:
        kind = jax.devices()[0].device_kind.lower()
    except Exception:
        pass
    if "v7" in kind:                         # v7x: 3.2 TB/s HBM, 64 MiB VMEM/TC
        return 8 << 20, 4
    if "v6" in kind or "trillium" in kind:   # v6e: 32 MiB scoped default
        return 8 << 20, 4
    if "v5" in kind and ("lite" in kind or "v5e" in kind):
        return 4 << 20, 2                    # v5e: 16 MiB scoped default
    return 4 << 20, 2                        # unknown / v4 / v5p: conservative


def _choose_block_f(bf, target_f):
    """Pick a folded-row tile: big, multiple-of-8, avoid ragged last step."""
    if bf <= target_f:
        if bf <= 16:
            return bf                                   # single full-extent tile
        # split into (>=2) balanced grid steps so megacore has work
        return min(bf, _round_up((bf + 1) // 2, 8))
    # prefer a multiple-of-8 divisor of bf near target_f (no ragged last block)
    for cand in range(target_f, target_f // 2, -8):
        if bf % cand == 0:
            return cand
    return target_f


def make_fogpass_filter_res1(w1, b1, w2, b2, *, fold=None, target_tile_bytes=None):
    """Precompute folded (block-diagonal) weights ONCE; return a jitted forward.

    w1: (H, D), b1: (H,), w2: (64, H), b2: (64,)  -- nn.Linear (out, in) layout.
    """
    H, D = w1.shape
    O = w2.shape[0]  # 64
    auto_bytes, auto_fold = _tpu_defaults()
    if fold is None:
        fold = auto_fold
    if target_tile_bytes is None:
        target_tile_bytes = auto_bytes
    dt = jnp.float32

    # ---- block-diagonal widened weights (built once, not per call) ----
    w1t = jnp.asarray(w1, dt).T                        # (D, H)
    w2t = jnp.asarray(w2, dt).T                        # (H, O)
    w1_wide = jnp.zeros((fold * D, fold * H), dt)
    w2_wide = jnp.zeros((fold * H, fold * O), dt)
    for r in range(fold):
        w1_wide = w1_wide.at[r * D:(r + 1) * D, r * H:(r + 1) * H].set(w1t)
        w2_wide = w2_wide.at[r * H:(r + 1) * H, r * O:(r + 1) * O].set(w2t)
    b1_wide = jnp.tile(jnp.asarray(b1, dt), fold).reshape(1, fold * H)
    b2_wide = jnp.tile(jnp.asarray(b2, dt), fold).reshape(1, fold * O)
    w1_wide, w2_wide, b1_wide, b2_wide = jax.block_until_ready(
        (w1_wide, w2_wide, b1_wide, b2_wide))

    # folded-row tile target from the generation-dependent x-tile byte budget
    target_f = max(16, (target_tile_bytes // (fold * D * 4)) // 8 * 8)

    def forward(x):
        B, d_in = x.shape
        if d_in != D:
            raise ValueError(f"expected input width {D}, got {d_in}")
        pad = (-B) % fold
        if pad:
            x = jnp.pad(x, ((0, pad), (0, 0)))
        b_pad = B + pad
        bf = b_pad // fold
        # fold rows: (b_pad, D) row-major == (bf, fold*D) row-major (free view)
        xw = x.reshape(bf, fold * D).astype(dt)

        block_f = _choose_block_f(bf, target_f)
        grid = (pl.cdiv(bf, block_f),)

        # Explicit VMEM budget: double-buffered x/out tiles + double-buffered
        # resident weights/biases + headroom for compiler-internal scratch.
        x_tile = block_f * fold * D * 4
        o_tile = block_f * fold * O * 4
        w_bytes = 4 * (w1_wide.size + w2_wide.size + b1_wide.size + b2_wide.size)
        vmem_bytes = int(min(max(2 * (x_tile + o_tile) + 2 * w_bytes + (4 << 20),
                                 24 << 20),
                             48 << 20))

        yw = pl.pallas_call(
            fogpass_mlp_kernel,
            out_shape=jax.ShapeDtypeStruct((bf, fold * O), dt),
            grid_spec=pltpu.PrefetchScalarGridSpec(
                num_scalar_prefetch=0,
                grid=grid,
                in_specs=[
                    pl.BlockSpec((block_f, fold * D), lambda i: (i, 0)),   # x tile
                    pl.BlockSpec((fold * D, fold * H), lambda i: (0, 0)),  # W1 (resident)
                    pl.BlockSpec((1, fold * H), lambda i: (0, 0)),         # b1
                    pl.BlockSpec((fold * H, fold * O), lambda i: (0, 0)),  # W2 (resident)
                    pl.BlockSpec((1, fold * O), lambda i: (0, 0)),         # b2
                ],
                out_specs=pl.BlockSpec((block_f, fold * O), lambda i: (i, 0)),
            ),
            compiler_params=pltpu.CompilerParams(
                dimension_semantics=("parallel",),
                vmem_limit_bytes=vmem_bytes,
            ),
        )(xw, w1_wide, b1_wide, w2_wide, b2_wide)

        # (bf, fold*64) row-major is bit-identical to (b_pad, 64); drop padding.
        return yw.reshape(b_pad, O)[:B]

    return jax.jit(forward)


def fogpass_filter_res1(x, w1, b1, w2, b2, **kwargs):
    """One-shot convenience wrapper (rebuilds widened weights; prefer the factory)."""
    return make_fogpass_filter_res1(w1, b1, w2, b2, **kwargs)(x)


def reference(x, w1, b1, w2, b2):
    h = x @ w1.T + b1
    h = jnp.where(h > 0, h, NEG_SLOPE * h)
    return h @ w2.T + b2


if __name__ == "__main__":
    key = jax.random.PRNGKey(0)
    k_x, k_w1, k_b1, k_w2, k_b2, k_x2, k_x3 = jax.random.split(key, 7)

    inputsize = 256                  # module __init__ arg
    hidden = inputsize // 8          # 32
    out_dim = 64

    # Deterministic synthetic parameters (nn.Linear layout: (out, in)).
    w1 = jax.random.normal(k_w1, (hidden, inputsize), dtype=jnp.float32) * 0.05
    b1 = jax.random.normal(k_b1, (hidden,), dtype=jnp.float32) * 0.05
    w2 = jax.random.normal(k_w2, (out_dim, hidden), dtype=jnp.float32) * 0.05
    b2 = jax.random.normal(k_b2, (out_dim,), dtype=jnp.float32) * 0.05

    # Build once: widened weights are precomputed and cached in the closure.
    fwd = make_fogpass_filter_res1(w1, b1, w2, b2)

    # Small even batch (single full-extent tile path).
    B = 8
    x = jax.random.normal(k_x, (B, inputsize), dtype=jnp.float32)
    y = jax.block_until_ready(fwd(x))
    y_ref = reference(x, w1, b1, w2, b2)
    assert y.shape == (B, out_dim)
    assert jnp.allclose(y, y_ref, atol=1e-4, rtol=1e-4)

    # Odd batch (exercises fold padding + output slicing).
    B2 = 37
    x2 = jax.random.normal(k_x2, (B2, inputsize), dtype=jnp.float32)
    y2 = jax.block_until_ready(fwd(x2))
    y2_ref = reference(x2, w1, b1, w2, b2)
    assert y2.shape == (B2, out_dim)
    assert jnp.allclose(y2, y2_ref, atol=1e-4, rtol=1e-4)

    # Moderate batch (exercises the multi-step / megacore-parallel grid path).
    B3 = 2048
    x3 = jax.random.normal(k_x3, (B3, inputsize), dtype=jnp.float32)
    y3 = jax.block_until_ready(fwd(x3))
    y3_ref = reference(x3, w1, b1, w2, b2)
    assert y3.shape == (B3, out_dim)
    assert jnp.allclose(y3, y3_ref, atol=1e-4, rtol=1e-4)

    print("KERNEL_OK")
</pallas_src>

<mosaic_0001>
module attributes {stable_mosaic.version = 11 : i64} {
  func.func @fogpass_mlp_kernel(%arg0: i32, %arg1: memref<4x512xf32, #tpu.memory_space<vmem>>, %arg2: memref<512x64xf32, #tpu.memory_space<vmem>>, %arg3: memref<1x64xf32, #tpu.memory_space<vmem>>, %arg4: memref<64x128xf32, #tpu.memory_space<vmem>>, %arg5: memref<1x128xf32, #tpu.memory_space<vmem>>, %arg6: memref<4x128xf32, #tpu.memory_space<vmem>>) attributes {dimension_semantics = [#tpu.dimension_semantics<parallel>], iteration_bounds = array<i64: 1>, scalar_prefetch = 0 : i64, scratch_operands = 0 : i64, tpu.core_type = #tpu.core_type<tc>, window_params = [{transform_indices = @transform_0, window_bounds = array<i64: 4, 512>}, {pipeline_mode = #tpu.pipeline_mode<synchronous>, transform_indices = @transform_1, window_bounds = array<i64: 512, 64>}, {pipeline_mode = #tpu.pipeline_mode<synchronous>, transform_indices = @transform_2, window_bounds = array<i64: 1, 64>}, {pipeline_mode = #tpu.pipeline_mode<synchronous>, transform_indices = @transform_3, window_bounds = array<i64: 64, 128>}, {pipeline_mode = #tpu.pipeline_mode<synchronous>, transform_indices = @transform_4, window_bounds = array<i64: 1, 128>}, {transform_indices = @transform_5, window_bounds = array<i64: 4, 128>}]} {
    %c0 = arith.constant 0 : index
    %c0_0 = arith.constant 0 : index
    %0 = vector.load %arg1[%c0, %c0_0] : memref<4x512xf32, #tpu.memory_space<vmem>>, vector<4x512xf32>
    %c0_1 = arith.constant 0 : index
    %c0_2 = arith.constant 0 : index
    %1 = vector.load %arg2[%c0_1, %c0_2] : memref<512x64xf32, #tpu.memory_space<vmem>>, vector<512x64xf32>
    %cst = arith.constant dense<0.000000e+00> : vector<4x64xf32>
    %2 = tpu.matmul %0, %1, %cst {dimension_numbers = #tpu.dot_dimension_numbers<[1], [0], [0], [1], [0, 0, 1, 1], [], []>, precision = #tpu.contract_precision<fp32>} : vector<4x512xf32>, vector<512x64xf32>, vector<4x64xf32> -> vector<4x64xf32>
    %c0_3 = arith.constant 0 : index
    %c0_4 = arith.constant 0 : index
    %3 = vector.load %arg3[%c0_3, %c0_4] : memref<1x64xf32, #tpu.memory_space<vmem>>, vector<1x64xf32>
    %4 = vector.broadcast %3 : vector<1x64xf32> to vector<4x64xf32>
    %5 = arith.addf %2, %4 : vector<4x64xf32>
    %cst_5 = arith.constant 0.000000e+00 : f32
    %6 = vector.broadcast %cst_5 : f32 to vector<4x64xf32>
    %7 = arith.cmpf ogt, %5, %6 : vector<4x64xf32>
    %cst_6 = arith.constant 0.00999999977 : f32
    %8 = vector.broadcast %cst_6 : f32 to vector<4x64xf32>
    %9 = arith.mulf %8, %5 : vector<4x64xf32>
    %10 = arith.select %7, %5, %9 : vector<4x64xi1>, vector<4x64xf32>
    %c0_7 = arith.constant 0 : index
    %c0_8 = arith.constant 0 : index
    %11 = vector.load %arg4[%c0_7, %c0_8] : memref<64x128xf32, #tpu.memory_space<vmem>>, vector<64x128xf32>
    %cst_9 = arith.constant dense<0.000000e+00> : vector<4x128xf32>
    %12 = tpu.matmul %10, %11, %cst_9 {dimension_numbers = #tpu.dot_dimension_numbers<[1], [0], [0], [1], [0, 0, 1, 1], [], []>, precision = #tpu.contract_precision<fp32>} : vector<4x64xf32>, vector<64x128xf32>, vector<4x128xf32> -> vector<4x128xf32>
    %c0_10 = arith.constant 0 : index
    %c0_11 = arith.constant 0 : index
    %13 = vector.load %arg5[%c0_10, %c0_11] : memref<1x128xf32, #tpu.memory_space<vmem>>, vector<1x128xf32>
    %14 = vector.broadcast %13 : vector<1x128xf32> to vector<4x128xf32>
    %15 = arith.addf %12, %14 : vector<4x128xf32>
    %c0_12 = arith.constant 0 : index
    %c0_13 = arith.constant 0 : index
    %16 = vector.load %arg6[%c0_12, %c0_13] : memref<4x128xf32, #tpu.memory_space<vmem>>, vector<4x128xf32>
    tpu.vector_store %arg6[%c0_12, %c0_13], %15 {strides = array<i32>} : memref<4x128xf32, #tpu.memory_space<vmem>>, vector<4x128xf32>,
    return
  }
  func.func @transform_0(%arg0: i32) -> (i32, i32) {
    %c0_i32 = arith.constant 0 : i32
    %c0_i32_0 = arith.constant 0 : i32
    return %arg0, %c0_i32 : i32, i32
  }
  func.func @transform_1(%arg0: i32) -> (i32, i32) {
    %c0_i32 = arith.constant 0 : i32
    %c0_i32_0 = arith.constant 0 : i32
    %c0_i32_1 = arith.constant 0 : i32
    return %c0_i32, %c0_i32_0 : i32, i32
  }
  func.func @transform_2(%arg0: i32) -> (i32, i32) {
    %c0_i32 = arith.constant 0 : i32
    %c0_i32_0 = arith.constant 0 : i32
    %c0_i32_1 = arith.constant 0 : i32
    return %c0_i32, %c0_i32_0 : i32, i32
  }
  func.func @transform_3(%arg0: i32) -> (i32, i32) {
    %c0_i32 = arith.constant 0 : i32
    %c0_i32_0 = arith.constant 0 : i32
    %c0_i32_1 = arith.constant 0 : i32
    return %c0_i32, %c0_i32_0 : i32, i32
  }
  func.func @transform_4(%arg0: i32) -> (i32, i32) {
    %c0_i32 = arith.constant 0 : i32
    %c0_i32_0 = arith.constant 0 : i32
    %c0_i32_1 = arith.constant 0 : i32
    return %c0_i32, %c0_i32_0 : i32, i32
  }
  func.func @transform_5(%arg0: i32) -> (i32, i32) {
    %c0_i32 = arith.constant 0 : i32
    %c0_i32_0 = arith.constant 0 : i32
    return %arg0, %c0_i32 : i32, i32
  }
}

</mosaic_0001>

<bundles_post_ra>
// kernel: forward.1
= control target key start
LH: loop header
LB: loop body
LE: loop exit
PB: predicated region body
PF: predicated region fallthrough
CT: control target
= control target key end

     0   :  { %10 = vsyncpa [#allocation3], 0  ;;  %s4775_s0 = inlined_call_operand.vmem [shape: f32[4,512], index: 0, kind: input, shape index: {}]   ;;  %s4776_s1 = inlined_call_operand.hbm [shape: f32[512,64], index: 1, kind: input, shape index: {}]   ;;  %s4777_s2 = inlined_call_operand.vmem [shape: f32[1,64], index: 2, kind: input, shape index: {}]   ;;  %s4778_s3 = inlined_call_operand.hbm [shape: f32[64,128], index: 3, kind: input, shape index: {}]   ;;  %s4779_s4 = inlined_call_operand.vmem [shape: f32[1,128], index: 4, kind: input, shape index: {}]   ;;  %s4780_s5 = inlined_call_operand.vmem [shape: f32[4,128], index: 5, kind: output, shape index: {}]  }
   0x1   :  { %11 = vsyncpa [#allocation5], 0  ;;  %s3530_s18 = smov [#allocation2]   ;;  %s3482_s22 = scalar_lea.hbm %s4776_s1, 8192 }
   0x2   :  { %s19_s19 = sshll.u32 %s3530_s18, 4  ;;  %p3483_p0 = scmp.ne.s32.totalorder %s4776_s1, %s3482_s22  ;;  %s20_s19 = int_to_ptr.vmem [resolvable:$true] %s19_s19 }
   0x3   :  { %p3486_p1 = scmp.lt.u32.totalorder %s3482_s22, %s4776_s1 }
   0x5   :  { %p3488_p2 = pnand %p3486_p1, %p3483_p0 }
   0x7   :  { %3491 = shalt.err (!%p3488_p2)
}
   0x8   :  { %s3492_s27 = scalar_lea.vmem %s20_s19, 8192  ;;  %p3497_p4 = scmp.lt.s32.totalorder %s20_s19, %s20_s19 }
   0x9   :  { %p3493_p3 = scmp.ne.s32.totalorder %s20_s19, %s3492_s27  ;;  %p3498_p5 = scmp.lt.s32.totalorder %s3492_s27, %s3492_s27 }
   0xb   :  { %p3499_p6 = por %p3498_p5, %p3497_p4 }
   0xd   :  { %p3500_p7 = pnand %p3499_p6, %p3493_p3 }
   0xf   :  { %3503 = shalt.err (!%p3500_p7)
}
  0x10   :  { %s3531_s28 = smov 128   ;;  %s3532_s29 = smov 8  }
  0x11   :  { %25 = dma.hbm_to_vmem [thread:$0]  %s4776_s1, 8192, %s20_s19, [#allocation3], %s3531_s28, %s3531_s28, %s3532_s29  }
  0x12   :  { %s3533_s7 = smov [#allocation4]   ;;  %s3504_s11 = scalar_lea.hbm %s4778_s3, 1024 }
  0x13   :  { %s33_s8 = sshll.u32 %s3533_s7, 4  ;;  %p3505_p8 = scmp.ne.s32.totalorder %s4778_s3, %s3504_s11  ;;  %s34_s8 = int_to_ptr.vmem [resolvable:$true] %s33_s8 }
  0x14   :  { %p3508_p9 = scmp.lt.u32.totalorder %s3504_s11, %s4778_s3 }
  0x16   :  { %p3510_p10 = pnand %p3508_p9, %p3505_p8 }
  0x18   :  { %3513 = shalt.err (!%p3510_p10)
}
  0x19   :  { %s3514_s16 = scalar_lea.vmem %s34_s8, 1024  ;;  %p3519_p12 = scmp.lt.s32.totalorder %s34_s8, %s34_s8 }
  0x1a   :  { %p3515_p11 = scmp.ne.s32.totalorder %s34_s8, %s3514_s16  ;;  %p3520_p13 = scmp.lt.s32.totalorder %s3514_s16, %s3514_s16 }
  0x1c   :  { %p3521_p0 = por %p3520_p13, %p3519_p12 }
  0x1e   :  { %p3522_p1 = pnand %p3521_p0, %p3515_p11 }
  0x20   :  { %3525 = shalt.err (!%p3522_p1)
}
  0x21   :  { %39 = dma.hbm_to_vmem [thread:$0]  %s4778_s3, 1024, %s34_s8, [#allocation5], %s3531_s28, %s3531_s28, %s3532_s29  }
  0x22   :  { %3526 = dma.done.wait [#allocation3], 8192  }
  0x23   :  { %3527 = vsyncadd [#allocation3], 4294959104 }
  0x24   :  { %3528 = dma.done.wait [#allocation5], 1024  }
  0x25   :  { %3529 = vsyncadd [#allocation5], 4294966272  ;;  %v66_v0 = vld [vmem:[#allocation2 + $0x80] sm:$0xff]  ;;  %v67_v1 = vld [vmem:[#allocation2 + $0x88] sm:$0xff]  ;;  %vm3535_vm0 = vmmov 0   ;;  %vm1869_vm2 = vcmask 523264  }
  0x26   :  { %v50_v2 = vld [vmem:[#allocation2] sm:$0xff]  ;;  %v176_v3 = vand.u32 4294901760, %v66_v0  ;;  %v179_v4 = vand.u32 4294901760, %v67_v1  ;;  %v51_v5 = vld [vmem:[#allocation2 + $0x8] sm:$0xff]  ;;  %v68_v7 = vld [vmem:[#allocation2 + $0x90] sm:$0xff] }
  0x27   :  { %v128_v6 = vand.u32 4294901760, %v50_v2  ;;  %v69_v8 = vld [vmem:[#allocation2 + $0x98] sm:$0xff]  ;;  %v131_v9 = vand.u32 4294901760, %v51_v5  ;;  %v182_v10 = vand.u32 4294901760, %v68_v7  ;;  %v52_v12 = vld [vmem:[#allocation2 + $0x10] sm:$0xff]  ;;  %v70_v14 = vld [vmem:[#allocation2 + $0xa0] sm:$0xff] }
  0x28   :  { %v185_v11 = vand.u32 4294901760, %v69_v8  ;;  %v53_v13 = vld [vmem:[#allocation2 + $0x18] sm:$0xff]  ;;  %v3591_v15 = vpack.c.bf16 %v179_v4, %v176_v3  ;;  %v3593_v16 = vsub.f32 %v66_v0, %v176_v3  ;;  %v3595_v17 = vsub.f32 %v67_v1, %v179_v4  ;;  %v71_v18 = vld [vmem:[#allocation2 + $0xa8] sm:$0xff]  ;;  %v54_v19 = vld [vmem:[#allocation2 + $0x20] sm:$0xff] }
  0x29   :  { %v55_v20 = vld [vmem:[#allocation2 + $0x28] sm:$0xff]  ;;  %v3597_v21 = vpack.c.bf16 %v131_v9, %v128_v6  ;;  %v3599_v22 = vsub.f32 %v50_v2, %v128_v6  ;;  %v3601_v23 = vsub.f32 %v51_v5, %v131_v9  ;;  %v72_v25 = vld [vmem:[#allocation2 + $0xb0] sm:$0xff]  ;;  %v3606_v26 = vsub.f32 %v68_v7, %v182_v10  ;;  %v73_v34 = vld [vmem:[#allocation2 + $0xb8] sm:$0xff] }
  0x2a   :  { %v3603_v24 = vpack.c.bf16 %v185_v11, %v182_v10  ;;  %3008 = vmatprep.subr.bf16.mxu1 %v3591_v15  ;;  %v134_v27 = vand.u32 4294901760, %v52_v12  ;;  %v137_v28 = vand.u32 4294901760, %v53_v13  ;;  %v188_v29 = vand.u32 4294901760, %v70_v14  ;;  %v56_v35 = vld [vmem:[#allocation2 + $0x30] sm:$0xff]  ;;  %v57_v36 = vld [vmem:[#allocation2 + $0x38] sm:$0xff]  ;;  %v74_v41 = vld [vmem:[#allocation2 + $0xc0] sm:$0xff] }
  0x2b   :  { %3010 = vmatpush3.bf16.msra.mxu1 %v3597_v21  ;;  %v3609_v30 = vsub.f32 %v69_v8, %v185_v11  ;;  %v191_v31 = vand.u32 4294901760, %v71_v18  ;;  %v140_v32 = vand.u32 4294901760, %v54_v19  ;;  %v143_v33 = vand.u32 4294901760, %v55_v20  ;;  %v75_v42 = vld [vmem:[#allocation2 + $0xc8] sm:$0xff]  ;;  %v58_v43 = vld [vmem:[#allocation2 + $0x40] sm:$0xff]  ;;  %v76_v57 = vld [vmem:[#allocation2 + $0xd0] sm:$0xff] }
  0x2c   :  { %3012 = vmatprep.subr.bf16.mxu1 %v3603_v24  ;;  %v3612_v37 = vpack.c.bf16 %v137_v28, %v134_v27  ;;  %v3614_v38 = vsub.f32 %v52_v12, %v134_v27  ;;  %v3616_v39 = vsub.f32 %v53_v13, %v137_v28  ;;  %v194_v40 = vand.u32 4294901760, %v72_v25  ;;  %v59_v48 = vld [vmem:[#allocation2 + $0x48] sm:$0xff]  ;;  %v77_v58 = vld [vmem:[#allocation2 + $0xd8] sm:$0xff]  ;;  %v60_v63 = vld [vmem:[#allocation2 + $0x50] sm:$0xff] }
  0x2d   :  { %v3618_v44 = vpack.c.bf16 %v191_v31, %v188_v29  ;;  %v3620_v45 = vsub.f32 %v70_v14, %v188_v29  ;;  %v3622_v46 = vsub.f32 %v71_v18, %v191_v31  ;;  %v3624_v47 = vpack.c.bf16 %v143_v33, %v140_v32  ;;  %v61_v0 = vld [vmem:[#allocation2 + $0x58] sm:$0xff]  ;;  %v78_v1 = vld [vmem:[#allocation2 + $0xe0] sm:$0xff]  ;;  %v79_v6 = vld [vmem:[#allocation2 + $0xe8] sm:$0xff] }
  0x2e   :  { %v3626_v49 = vsub.f32 %v54_v19, %v140_v32  ;;  %v3628_v50 = vsub.f32 %v55_v20, %v143_v33  ;;  %v197_v51 = vand.u32 4294901760, %v73_v34  ;;  %v146_v52 = vand.u32 4294901760, %v56_v35  ;;  %v62_v7 = vld [vmem:[#allocation2 + $0x60] sm:$0xff]  ;;  %v63_v8 = vld [vmem:[#allocation2 + $0x68] sm:$0xff]  ;;  %v80_v29 = vld [vmem:[#allocation2 + $0xf0] sm:$0xff] }
  0x2f   :  { %4902 = vst [vmem:[#allocation8_spill] sm:$0xff] %v3624_v47  ;;  %3014 = vmatpush3.bf16.msra.mxu1 %v3612_v37  ;;  %v149_v53 = vand.u32 4294901760, %v57_v36  ;;  %v200_v54 = vand.u32 4294901760, %v74_v41  ;;  %v203_v55 = vand.u32 4294901760, %v75_v42  ;;  %v152_v56 = vand.u32 4294901760, %v58_v43 }
  0x30   :  { %3016 = vmatprep.subr.bf16.mxu1 %v3618_v44  ;;  %v3632_v59 = vpack.c.bf16 %v197_v51, %v194_v40  ;;  %v3634_v60 = vsub.f32 %v72_v25, %v194_v40  ;;  %v3636_v61 = vsub.f32 %v73_v34, %v197_v51  ;;  %v155_v62 = vand.u32 4294901760, %v59_v48  ;;  %v65_v40 = vld [vmem:[#allocation2 + $0x78] sm:$0xff] }
  0x31   :  { %v3638_v2 = vpack.c.bf16 %v149_v53, %v146_v52  ;;  %v3640_v3 = vsub.f32 %v56_v35, %v146_v52  ;;  %v3642_v4 = vsub.f32 %v57_v36, %v149_v53  ;;  %v3644_v5 = vpack.c.bf16 %v203_v55, %v200_v54  ;;  %v81_v35 = vld [vmem:[#allocation2 + $0xf8] sm:$0xff]  ;;  %v64_v36 = vld [vmem:[#allocation2 + $0x70] sm:$0xff] }
  0x32   :  { %4903 = vst [vmem:[#allocation9_spill] sm:$0xff] %v3632_v59  ;;  %v3646_v9 = vsub.f32 %v74_v41, %v200_v54  ;;  %v3648_v10 = vsub.f32 %v75_v42, %v203_v55  ;;  %v3650_v11 = vpack.c.bf16 %v155_v62, %v152_v56  ;;  %v3652_v12 = vsub.f32 %v58_v43, %v152_v56 }
  0x33   :  { %4904 = vst [vmem:[#allocation10_spill] sm:$0xff] %v3638_v2  ;;  %4905 = vst [vmem:[#allocation11_spill] sm:$0xff] %v3644_v5  ;;  %3018 = vmatpush3.bf16.msra.mxu1 %v3624_v47  ;;  %v206_v13 = vand.u32 4294901760, %v76_v57  ;;  %v209_v14 = vand.u32 4294901760, %v77_v58  ;;  %v158_v18 = vand.u32 4294901760, %v60_v63  ;;  %v161_v19 = vand.u32 4294901760, %v61_v0 }
  0x34   :  { %4906 = vst [vmem:[#allocation12_spill] sm:$0xff] %v3650_v11  ;;  %3020 = vmatprep.subr.bf16.mxu1 %v3632_v59  ;;  %v212_v20 = vand.u32 4294901760, %v78_v1  ;;  %v215_v25 = vand.u32 4294901760, %v79_v6  ;;  %v164_v27 = vand.u32 4294901760, %v62_v7  ;;  %v167_v28 = vand.u32 4294901760, %v63_v8 }
  0x35   :  { %v3656_v31 = vsub.f32 %v59_v48, %v155_v62  ;;  %v3658_v32 = vpack.c.bf16 %v209_v14, %v206_v13  ;;  %v3660_v33 = vsub.f32 %v76_v57, %v206_v13  ;;  %v3662_v34 = vsub.f32 %v77_v58, %v209_v14  ;;  %v48_v48 = vld [vmem:[%s4775_s0] sm:$0xff] }
  0x36   :  { %v3664_v41 = vpack.c.bf16 %v161_v19, %v158_v18  ;;  %v3666_v42 = vsub.f32 %v60_v63, %v158_v18  ;;  %v3668_v43 = vsub.f32 %v61_v0, %v161_v19  ;;  %v3670_v51 = vpack.c.bf16 %v215_v25, %v212_v20 }
  0x37   :  { %4907 = vst [vmem:[#allocation13_spill] sm:$0xff] %v3658_v32  ;;  %3022 = vmatpush3.bf16.msra.mxu1 %v3638_v2  ;;  %v3676_v52 = vsub.f32 %v78_v1, %v212_v20  ;;  %v3678_v53 = vsub.f32 %v79_v6, %v215_v25  ;;  %v3680_v54 = vpack.c.bf16 %v167_v28, %v164_v27  ;;  %v218_v56 = vand.u32 4294901760, %v80_v29 }
  0x38   :  { %4908 = vst [vmem:[#allocation14_spill] sm:$0xff] %v3664_v41  ;;  %4909 = vst [vmem:[#allocation15_spill] sm:$0xff] %v3670_v51  ;;  %v3682_v55 = vsub.f32 %v62_v7, %v164_v27  ;;  %3024 = vmatprep.subr.bf16.mxu1 %v3644_v5  ;;  %v221_v57 = vand.u32 4294901760, %v81_v35  ;;  %v170_v58 = vand.u32 4294901760, %v64_v36  ;;  %v173_v62 = vand.u32 4294901760, %v65_v40 }
  0x39   :  { %4910 = vst [vmem:[#allocation16_spill] sm:$0xff] %v3680_v54  ;;  %v123_v63 = vcombine.high %v48_v48, %v48_v48  ;;  %v3685_v0 = vand.u32 4294901760, %v48_v48  ;;  %v4781_v13 = vand.u32 4294901760, %v3593_v16  ;;  %v4782_v1 = vand.u32 4294901760, %v3595_v17 }
  0x3a   :  { %v3689_v14 = vsub.f32 %v63_v8, %v167_v28  ;;  %v3691_v6 = vpack.c.bf16 %v221_v57, %v218_v56  ;;  %v3693_v18 = vsub.f32 %v80_v29, %v218_v56  ;;  %v3695_v7 = vsub.f32 %v81_v35, %v221_v57 }
  0x3b   :  { %3026 = vmatpush3.bf16.msra.mxu1 %v3650_v11  ;;  %v3698_v19 = vpack.c.bf16 %v173_v62, %v170_v58  ;;  %v3700_v20 = vsub.f32 %v64_v36, %v170_v58  ;;  %v3702_v25 = vand.u32 4294901760, %v123_v63  ;;  %v3705_v27 = vsub.f32 %v48_v48, %v3685_v0 }
  0x3c   :  { %4911 = vst [vmem:[#allocation17_spill] sm:$0xff] %v3691_v6  ;;  %3028 = vmatprep.subr.bf16.mxu1 %v3658_v32  ;;  %v355_v8 = vsub.f32 %v3593_v16, %v4781_v13  ;;  %v362_v28 = vsub.f32 %v3595_v17, %v4782_v1  ;;  %v4787_v29 = vand.u32 4294901760, %v3599_v22  ;;  %v4792_v35 = vand.u32 4294901760, %v3601_v23 }
  0x3d   :  { %4912 = vst [vmem:[#allocation18_spill] sm:$0xff] %v3698_v19  ;;  %v3717_v36 = vsub.f32 %v123_v63, %v3702_v25  ;;  %v4797_v48 = vand.u32 4294901760, %v3705_v27  ;;  %v3071_v56 = vpack.c.bf16 %v3595_v17, %v3593_v16  ;;  %v3073_v57 = vpack.c.bf16 %v3601_v23, %v3599_v22 }
  0x3e   :  { %v356_v58 = vand.u32 4294901760, %v355_v8  ;;  %v363_v13 = vand.u32 4294901760, %v362_v28  ;;  %v243_v1 = vsub.f32 %v3599_v22, %v4787_v29  ;;  %v250_v32 = vsub.f32 %v3601_v23, %v4792_v35 }
  0x3f   :  { %3030 = vmatpush3.bf16.msra.mxu1 %v3664_v41  ;;  %v4798_v63 = vand.u32 4294901760, %v3717_v36  ;;  %v232_v11 = vsub.f32 %v3705_v27, %v4797_v48  ;;  %3072 = vmatprep.subr.bf16.mxu0 %v3071_v56  ;;  %v4801_v8 = vand.u32 4294901760, %v3606_v26  ;;  %v4800_v28 = vand.u32 4294901760, %v3609_v30 }
  0x40   :  { %3032 = vmatprep.subr.bf16.mxu1 %v3670_v51  ;;  %v3738_v29 = vsub.f32 %v65_v40, %v173_v62  ;;  %v244_v5 = vand.u32 4294901760, %v243_v1  ;;  %v251_v2 = vand.u32 4294901760, %v250_v32  ;;  %3074 = vmatpush3.bf16.msra.mxu0 %v3073_v57  ;;  %v4799_v35 = vand.u32 4294901760, %v3614_v38 }
  0x41   :  { %v226_v41 = vsub.f32 %v3717_v36, %v4798_v63  ;;  %v3039_v59 = vpack.c.bf16 %v363_v13, %v356_v58  ;;  %v369_v56 = vsub.f32 %v3606_v26, %v4801_v8  ;;  %v376_v48 = vsub.f32 %v3609_v30, %v4800_v28  ;;  %601 = vmatprep.mubr.f32.mxu0 %v3717_v36 }
  0x42   :  { %v233_v40 = vand.u32 4294901760, %v232_v11  ;;  %v257_v32 = vsub.f32 %v3614_v38, %v4799_v35  ;;  %v4806_v62 = vand.u32 4294901760, %v3616_v39  ;;  %v3075_v13 = vpack.c.bf16 %v3609_v30, %v3606_v26 }
  0x43   :  { %3034 = vmatpush3.bf16.msra.mxu1 %v3680_v54  ;;  %v227_v1 = vand.u32 4294901760, %v226_v41  ;;  %v3041_v57 = vpack.c.bf16 %v251_v2, %v244_v5  ;;  %v370_v58 = vand.u32 4294901760, %v369_v56  ;;  %v3077_v63 = vpack.c.bf16 %v3616_v39, %v3614_v38 }
  0x44   :  { %3036 = vmatprep.subr.bf16.mxu1 %v3691_v6  ;;  %v377_v11 = vand.u32 4294901760, %v376_v48  ;;  %v264_v35 = vsub.f32 %v3616_v39, %v4806_v62  ;;  %3076 = vmatprep.subr.bf16.mxu0 %v3075_v13  ;;  %v4804_v28 = vand.u32 4294901760, %v3620_v45  ;;  %v4805_v8 = vand.u32 4294901760, %v3622_v46 }
  0x45   :  { %228 = vmatprep.mubr.f32.mxu1 %v227_v1  ;;  %v258_v54 = vand.u32 4294901760, %v257_v32  ;;  %3078 = vmatpush3.bf16.msra.mxu0 %v3077_v63  ;;  %v4815_v2 = vand.u32 4294901760, %v3626_v49  ;;  %v4816_v5 = vand.u32 4294901760, %v3628_v50  ;;  %v3079_v41 = vpack.c.bf16 %v3622_v46, %v3620_v45 }
  0x46   :  { %v265_v48 = vand.u32 4294901760, %v264_v35  ;;  %v383_v56 = vsub.f32 %v3620_v45, %v4804_v28  ;;  %v390_v13 = vsub.f32 %v3622_v46, %v4805_v8  ;;  %v3081_v32 = vpack.c.bf16 %v3628_v50, %v3626_v49 }
  0x47   :  { %3038 = vmatpush3.bf16.msra.mxu1 %v3698_v19  ;;  %v271_v63 = vsub.f32 %v3626_v49, %v4815_v2  ;;  %v278_v35 = vsub.f32 %v3628_v50, %v4816_v5  ;;  %3080 = vmatprep.subr.bf16.mxu0 %v3079_v41  ;;  %v396_v1 = vand.u32 4294901760, %v3634_v60  ;;  %v4821_v28 = vand.u32 4294901760, %v3636_v61 }
  0x48   :  { %3040 = vmatprep.subr.bf16.mxu1 %v3039_v59  ;;  %v3043_v8 = vpack.c.bf16 %v377_v11, %v370_v58  ;;  %v384_v62 = vand.u32 4294901760, %v383_v56  ;;  %v391_v6 = vand.u32 4294901760, %v390_v13  ;;  %v4820_v51 = vand.u32 4294901760, %v3640_v3 }
  0x49   :  { %v272_v19 = vand.u32 4294901760, %v271_v63  ;;  %v279_v47 = vand.u32 4294901760, %v278_v35  ;;  %3082 = vmatpush3.bf16.msra.mxu0 %v3081_v32  ;;  %v397_v2 = vsub.f32 %v3634_v60, %v396_v1  ;;  %v404_v41 = vsub.f32 %v3636_v61, %v4821_v28 }
  0x4a   :  { %234 = vmatmul.mubr.f32.vlgmr.msra.gmra.mrb[0].mxu1 %v233_v40  ;;  %v3045_v5 = vpack.c.bf16 %v265_v48, %v258_v54  ;;  %v285_v59 = vsub.f32 %v3640_v3, %v4820_v51  ;;  %v4819_v58 = vand.u32 4294901760, %v3642_v4  ;;  %v3083_v11 = vpack.c.bf16 %v3636_v61, %v3634_v60 }
  0x4b   :  { %3042 = vmatpush3.bf16.msra.mxu1 %v3041_v57  ;;  %v3047_v56 = vpack.c.bf16 %v391_v6, %v384_v62  ;;  %v3049_v13 = vpack.c.bf16 %v279_v47, %v272_v19  ;;  %v398_v32 = vand.u32 4294901760, %v397_v2  ;;  %v3085_v63 = vpack.c.bf16 %v3642_v4, %v3640_v3  ;;  %464 = vmatprep.mubr.f32.mxu1 %v3702_v25 }
  0x4c   :  { %3044 = vmatprep.subr.bf16.mxu1 %v3043_v8  ;;  %v405_v54 = vand.u32 4294901760, %v404_v41  ;;  %v292_v40 = vsub.f32 %v3642_v4, %v4819_v58  ;;  %3084 = vmatprep.subr.bf16.mxu0 %v3083_v11  ;;  %v4817_v48 = vand.u32 4294901760, %v3646_v9  ;;  %v4818_v35 = vand.u32 4294901760, %v3648_v10 }
  0x4d   :  { %v286_v57 = vand.u32 4294901760, %v285_v59  ;;  %3086 = vmatpush3.bf16.msra.mxu0 %v3085_v63  ;;  %v4822_v47 = vand.u32 4294901760, %v3652_v12  ;;  %v4823_v6 = vand.u32 4294901760, %v3656_v31  ;;  %v3087_v19 = vpack.c.bf16 %v3648_v10, %v3646_v9 }
  0x4e   :  { %v293_v8 = vand.u32 4294901760, %v292_v40  ;;  %v411_v62 = vsub.f32 %v3646_v9, %v4817_v48  ;;  %v418_v2 = vsub.f32 %v3648_v10, %v4818_v35  ;;  %v3089_v41 = vpack.c.bf16 %v3656_v31, %v3652_v12 }
  0x4f   :  { %3046 = vmatpush3.bf16.msra.mxu1 %v3045_v5  ;;  %v299_v59 = vsub.f32 %v3652_v12, %v4822_v47  ;;  %v306_v11 = vsub.f32 %v3656_v31, %v4823_v6  ;;  %3088 = vmatprep.subr.bf16.mxu0 %v3087_v19  ;;  %v4831_v63 = vand.u32 4294901760, %v3660_v33  ;;  %v4825_v40 = vand.u32 4294901760, %v3662_v34 }
  0x50   :  { %3048 = vmatprep.subr.bf16.mxu1 %v3047_v56  ;;  %v3051_v48 = vpack.c.bf16 %v405_v54, %v398_v32  ;;  %v412_v35 = vand.u32 4294901760, %v411_v62  ;;  %v419_v58 = vand.u32 4294901760, %v418_v2  ;;  %v4824_v51 = vand.u32 4294901760, %v3666_v42 }
  0x51   :  { %v300_v5 = vand.u32 4294901760, %v299_v59  ;;  %v307_v28 = vand.u32 4294901760, %v306_v11  ;;  %3090 = vmatpush3.bf16.msra.mxu0 %v3089_v41  ;;  %v425_v47 = vsub.f32 %v3660_v33, %v4831_v63  ;;  %v432_v19 = vsub.f32 %v3662_v34, %v4825_v40 }
  0x52   :  { %v3053_v6 = vpack.c.bf16 %v293_v8, %v286_v57  ;;  %v313_v56 = vsub.f32 %v3666_v42, %v4824_v51  ;;  %v4828_v32 = vand.u32 4294901760, %v3668_v43  ;;  %v3091_v54 = vpack.c.bf16 %v3662_v34, %v3660_v33 }
  0x53   :  { %3050 = vmatpush3.bf16.msra.mxu1 %v3049_v13  ;;  %v3055_v62 = vpack.c.bf16 %v419_v58, %v412_v35  ;;  %v3057_v2 = vpack.c.bf16 %v307_v28, %v300_v5  ;;  %v426_v41 = vand.u32 4294901760, %v425_v47  ;;  %v3093_v59 = vpack.c.bf16 %v3668_v43, %v3666_v42 }
  0x54   :  { %3052 = vmatprep.subr.bf16.mxu1 %v3051_v48  ;;  %v433_v11 = vand.u32 4294901760, %v432_v19  ;;  %v320_v57 = vsub.f32 %v3668_v43, %v4828_v32  ;;  %3092 = vmatprep.subr.bf16.mxu0 %v3091_v54  ;;  %v4827_v8 = vand.u32 4294901760, %v3676_v52  ;;  %v4826_v51 = vand.u32 4294901760, %v3678_v53 }
  0x55   :  { %v314_v40 = vand.u32 4294901760, %v313_v56  ;;  %3094 = vmatpush3.bf16.msra.mxu0 %v3093_v59  ;;  %v4830_v58 = vand.u32 4294901760, %v3682_v55  ;;  %v4829_v28 = vand.u32 4294901760, %v3689_v14  ;;  %v3095_v13 = vpack.c.bf16 %v3678_v53, %v3676_v52 }
  0x56   :  { %v321_v48 = vand.u32 4294901760, %v320_v57  ;;  %v439_v35 = vsub.f32 %v3676_v52, %v4827_v8  ;;  %v446_v47 = vsub.f32 %v3678_v53, %v4826_v51  ;;  %v3097_v5 = vpack.c.bf16 %v3689_v14, %v3682_v55 }
  0x57   :  { %3054 = vmatpush3.bf16.msra.mxu1 %v3053_v6  ;;  %v327_v19 = vsub.f32 %v3682_v55, %v4830_v58  ;;  %v334_v56 = vsub.f32 %v3689_v14, %v4829_v28  ;;  %3096 = vmatprep.subr.bf16.mxu0 %v3095_v13  ;;  %v452_v54 = vand.u32 4294901760, %v3693_v18  ;;  %v4832_v59 = vand.u32 4294901760, %v3695_v7 }
  0x58   :  { %3056 = vmatprep.subr.bf16.mxu1 %v3055_v62  ;;  %v3059_v57 = vpack.c.bf16 %v433_v11, %v426_v41  ;;  %v440_v51 = vand.u32 4294901760, %v439_v35  ;;  %v447_v8 = vand.u32 4294901760, %v446_v47  ;;  %v4834_v32 = vand.u32 4294901760, %v3700_v20 }
  0x59   :  { %3098 = vmatpush3.bf16.msra.mxu0 %v3097_v5  ;;  %v453_v6 = vsub.f32 %v3693_v18, %v452_v54  ;;  %v460_v28 = vsub.f32 %v3695_v7, %v4832_v59  ;;  %v3061_v13 = vpack.c.bf16 %v321_v48, %v314_v40  ;;  %v328_v58 = vand.u32 4294901760, %v327_v19 }
  0x5a   :  { %v4833_v63 = vand.u32 4294901760, %v3738_v29  ;;  %v3099_v62 = vpack.c.bf16 %v3695_v7, %v3693_v18  ;;  %v3063_v41 = vpack.c.bf16 %v447_v8, %v440_v51  ;;  %v335_v11 = vand.u32 4294901760, %v334_v56  ;;  %v4945_v18 = vld [vmem:[#allocation11_spill] sm:$0xff] }
  0x5b   :  { %3058 = vmatpush3.bf16.msra.mxu1 %v3057_v2  ;;  %v341_v35 = vsub.f32 %v3700_v20, %v4834_v32  ;;  %v3101_v47 = vpack.c.bf16 %v3738_v29, %v3700_v20  ;;  %v454_v5 = vand.u32 4294901760, %v453_v6  ;;  %v461_v59 = vand.u32 4294901760, %v460_v28 }
  0x5c   :  { %3060 = vmatprep.subr.bf16.mxu1 %v3059_v57  ;;  %v348_v40 = vsub.f32 %v3738_v29, %v4833_v63  ;;  %3100 = vmatprep.subr.bf16.mxu0 %v3099_v62  ;;  %v4913_v48 = vand.u32 4294901760, %v3593_v16  ;;  %v4914_v51 = vand.u32 4294901760, %v3595_v17  ;;  %v4915_v8 = vand.u32 4294901760, %v3599_v22 }
  0x5d   :  { %3102 = vmatpush3.bf16.msra.mxu0 %v3101_v47  ;;  %v4916_v19 = vand.u32 4294901760, %v3601_v23  ;;  %v4917_v57 = vand.u32 4294901760, %v3606_v26  ;;  %v4918_v28 = vand.u32 4294901760, %v3609_v30  ;;  %v3065_v63 = vpack.c.bf16 %v335_v11, %v328_v58 }
  0x5e   :  { %v3135_v2 = vpack.c.bf16 %v4914_v51, %v4913_v48  ;;  %v342_v62 = vand.u32 4294901760, %v341_v35  ;;  %v349_v32 = vand.u32 4294901760, %v348_v40  ;;  %v3067_v16 = vpack.c.bf16 %v461_v59, %v454_v5  ;;  %v3954_v40 = vld [vmem:[#allocation2 + $0x180] sm:$0xff]  ;;  %v3956_v48 = vld [vmem:[#allocation2 + $0x188] sm:$0xff] }
  0x5f   :  { %v3137_v56 = vpack.c.bf16 %v4916_v19, %v4915_v8  ;;  %v3139_v6 = vpack.c.bf16 %v4918_v28, %v4917_v57  ;;  %3062 = vmatpush3.bf16.msra.mxu1 %v3061_v13  ;;  %v4919_v17 = vand.u32 4294901760, %v3614_v38  ;;  %v4920_v22 = vand.u32 4294901760, %v3616_v39  ;;  %v3971_v57 = vld [vmem:[#allocation2 + $0x100] sm:$0xff]  ;;  %v3973_v28 = vld [vmem:[#allocation2 + $0x108] sm:$0xff] }
  0x60   :  { %3136 = vmatprep.subr.bf16.mxu0 %v3135_v2  ;;  %3064 = vmatprep.subr.bf16.mxu1 %v3063_v41  ;;  %v4921_v26 = vand.u32 4294901760, %v3620_v45  ;;  %v4922_v30 = vand.u32 4294901760, %v3622_v46  ;;  %v3069_v13 = vpack.c.bf16 %v349_v32, %v342_v62  ;;  %v4923_v59 = vand.u32 4294901760, %v3626_v49 }
  0x61   :  { %604 = vmatmul.mubr.f32.vlgmr.msra.gmra.mrb[0].mxu0 %v3705_v27  ;;  %v3141_v23 = vpack.c.bf16 %v4920_v22, %v4919_v17  ;;  %v4924_v41 = vand.u32 4294901760, %v3628_v50  ;;  %v4925_v39 = vand.u32 4294901760, %v3636_v61  ;;  %v4926_v45 = vand.u32 4294901760, %v3640_v3 }
  0x62   :  { %3138 = vmatpush3.bf16.msra.mxu0 %v3137_v56  ;;  %878 = vmatprep.mubr.f32.mxu0 %v3702_v25  ;;  %v3143_v58 = vpack.c.bf16 %v4922_v30, %v4921_v26  ;;  %v4927_v46 = vand.u32 4294901760, %v3642_v4  ;;  %v4928_v49 = vand.u32 4294901760, %v3646_v9  ;;  %v4929_v50 = vand.u32 4294901760, %v3648_v10 }
  0x63   :  { %3140 = vmatprep.subr.bf16.mxu0 %v3139_v6  ;;  %3066 = vmatpush3.bf16.msra.mxu1 %v3065_v63  ;;  %v3145_v38 = vpack.c.bf16 %v4924_v41, %v4923_v59  ;;  %v3147_v11 = vpack.c.bf16 %v4925_v39, %v396_v1  ;;  %v4930_v61 = vand.u32 4294901760, %v3717_v36  ;;  %v4931_v3 = vand.u32 4294901760, %v3652_v12  ;;  %v3978_v6 = vld [vmem:[#allocation2 + $0x198] sm:$0xff]  ;;  %v4005_v59 = vld [vmem:[#allocation2 + $0x1a0] sm:$0xff]  ;;  %v4007_v41 = vld [vmem:[#allocation2 + $0x1a8] sm:$0xff] }
  0x64   :  { %3068 = vmatprep.subr.bf16.mxu1 %v3067_v16  ;;  %v3149_v63 = vpack.c.bf16 %v4927_v46, %v4926_v45  ;;  %v3151_v60 = vpack.c.bf16 %v4929_v50, %v4928_v49  ;;  %v4932_v4 = vand.u32 4294901760, %v3656_v31  ;;  %v4933_v32 = vand.u32 4294901760, %v3660_v33  ;;  %v3951_v33 = vld [vmem:[%s4775_s0 + $0x8] sm:$0xff] }
  0x65   :  { %v4934_v9 = vand.u32 4294901760, %v3662_v34  ;;  %v4935_v36 = vand.u32 4294901760, %v3666_v42  ;;  %v4936_v35 = vand.u32 4294901760, %v3668_v43  ;;  %v4937_v12 = vand.u32 4294901760, %v3676_v52  ;;  %v4939_v34 = vld [vmem:[#allocation8_spill] sm:$0xff]  ;;  %v4940_v42 = vld [vmem:[#allocation9_spill] sm:$0xff] }
  0x66   :  { %3142 = vmatpush3.bf16.msra.mxu0 %v3141_v23  ;;  %v3153_v1 = vpack.c.bf16 %v4932_v4, %v4931_v3  ;;  %v4938_v31 = vand.u32 4294901760, %v3678_v53  ;;  %v4941_v43 = vand.u32 4294901760, %v3682_v55  ;;  %v4942_v52 = vand.u32 4294901760, %v3689_v14  ;;  %v4944_v55 = vld [vmem:[#allocation10_spill] sm:$0xff]  ;;  %v4949_v39 = vld [vmem:[#allocation13_spill] sm:$0xff] }
  0x67   :  { %3144 = vmatprep.subr.bf16.mxu0 %v3143_v58  ;;  %3070 = vmatpush3.bf16.msra.mxu1 %v3069_v13  ;;  %v3155_v10 = vpack.c.bf16 %v4934_v9, %v4933_v32  ;;  %v3157_v47 = vpack.c.bf16 %v4936_v35, %v4935_v36  ;;  %v124_v51 = vcombine.high %v3951_v33, %v3951_v33  ;;  %v4943_v2 = vand.u32 4294901760, %v3695_v7  ;;  %v3976_v14 = vld [vmem:[#allocation2 + $0x190] sm:$0xff]  ;;  %v4002_v58 = vld [vmem:[#allocation2 + $0x118] sm:$0xff]  ;;  %v4948_v13 = vld [vmem:[#allocation12_spill] sm:$0xff] }
  0x68   :  { %3104 = vmatprep.subr.bf16.mxu1 %v3591_v15  ;;  %v3159_v5 = vpack.c.bf16 %v4938_v31, %v4937_v12  ;;  %v3161_v53 = vpack.c.bf16 %v4942_v52, %v4941_v43  ;;  %v4853_v19 = vand.u32 4294901760, %v3954_v40  ;;  %v4852_v56 = vand.u32 4294901760, %v3956_v48  ;;  %v4033_v3 = vld [vmem:[#allocation2 + $0x128] sm:$0xff]  ;;  %v4951_v4 = vld [vmem:[#allocation14_spill] sm:$0xff]  ;;  %v4038_v32 = vld [vmem:[#allocation2 + $0x1b8] sm:$0xff] }
  0x69   :  { %v3163_v8 = vpack.c.bf16 %v4943_v2, %v452_v54  ;;  %v3980_v62 = vand.u32 4294901760, %v124_v51  ;;  %v4946_v7 = vand.u32 4294901760, %v3700_v20  ;;  %v4947_v54 = vand.u32 4294901760, %v3738_v29  ;;  %v4000_v29 = vld [vmem:[#allocation2 + $0x110] sm:$0xff]  ;;  %v4062_v52 = vld [vmem:[#allocation2 + $0x138] sm:$0xff]  ;;  %v4067_v2 = vld [vmem:[#allocation2 + $0x1c8] sm:$0xff] }
  0x6a   :  { %3146 = vmatpush3.bf16.msra.mxu0 %v3145_v38  ;;  %466 = vmatmul.mubr.f32.vlgmr.msra.gmra.mrb[2].mxu1 %v3685_v0  ;;  %v4851_v17 = vand.u32 4294901760, %v3971_v57  ;;  %v4848_v22 = vand.u32 4294901760, %v3973_v28  ;;  %v3996_v26 = vpack.c.bf16 %v4852_v56, %v4853_v19  ;;  %v4845_v30 = vand.u32 4294901760, %v3976_v14  ;;  %v4060_v43 = vld [vmem:[#allocation2 + $0x130] sm:$0xff]  ;;  %v4150_v19 = vld [vmem:[#allocation2 + $0x160] sm:$0xff] }
  0x6b   :  { %3148 = vmatprep.subr.bf16.mxu0 %v3147_v11  ;;  %3106 = vmatpush3.bf16.msra.mxu1 %v3597_v21  ;;  %v3165_v16 = vpack.c.bf16 %v4947_v54, %v4946_v7  ;;  %v3990_v23 = vsub.f32 %v124_v51, %v3980_v62  ;;  %v4844_v20 = vand.u32 4294901760, %v3978_v6  ;;  %v4843_v45 = vand.u32 4294901760, %v4000_v29  ;;  %v4065_v51 = vld [vmem:[#allocation2 + $0x1c0] sm:$0xff] }
  0x6c   :  { %708 = vmatprep.mubr.f32.mxu1 %v4930_v61  ;;  %3108 = vmatprep.subr.bf16.mxu1 %v3603_v24  ;;  %v4015_v11 = vpack.c.bf16 %v4848_v22, %v4851_v17  ;;  %v4840_v46 = vand.u32 4294901760, %v4002_v58  ;;  %v4839_v50 = vand.u32 4294901760, %v4005_v59  ;;  %v4031_v61 = vld [vmem:[#allocation2 + $0x120] sm:$0xff]  ;;  %v4847_v54 = vand.u32 4294901760, %v4060_v43  ;;  %v4120_v22 = vld [vmem:[#allocation2 + $0x158] sm:$0xff] }
  0x6d   :  { %v4835_v38 = vand.u32 4294901760, %v3990_v23  ;;  %v4027_v49 = vpack.c.bf16 %v4844_v20, %v4845_v30  ;;  %v4838_v35 = vand.u32 4294901760, %v4031_v61  ;;  %v4961_v20 = vand.u32 4294901760, %v3705_v27  ;;  %v4123_v27 = vld [vmem:[#allocation2 + $0x1e0] sm:$0xff]  ;;  %v4157_v17 = vld [vmem:[#allocation2 + $0x1f8] sm:$0xff] }
  0x6e   :  { %3150 = vmatpush3.bf16.msra.mxu0 %v3149_v63  ;;  %v4047_v36 = vpack.c.bf16 %v4840_v46, %v4843_v45  ;;  %v4095_v46 = vld [vmem:[#allocation2 + $0x1d8] sm:$0xff]  ;;  %v4967_v56 = vand.u32 4294901760, %v3971_v57 }
  0x6f   :  { %3152 = vmatprep.subr.bf16.mxu0 %v3151_v60  ;;  %3110 = vmatpush3.bf16.msra.mxu1 %v3612_v37  ;;  %v1088_v63 = vsub.f32 %v3990_v23, %v4835_v38  ;;  %4950 = vst [vmem:[#allocation8_spill] sm:$0xff] %v4027_v49  ;;  %v4836_v60 = vand.u32 4294901760, %v4007_v41  ;;  %v4849_v38 = vand.u32 4294901760, %v4067_v2 }
  0x70   :  { %3112 = vmatprep.subr.bf16.mxu1 %v3618_v44  ;;  %4953 = vst [vmem:[#allocation9_spill] sm:$0xff] %v4047_v36 }
  0x71   :  { %v1089_v9 = vand.u32 4294901760, %v1088_v63  ;;  %v4056_v12 = vpack.c.bf16 %v4836_v60, %v4839_v50  ;;  %v4088_v60 = vld [vmem:[#allocation2 + $0x140] sm:$0xff]  ;;  %v4093_v50 = vld [vmem:[#allocation2 + $0x1d0] sm:$0xff] }
  0x72   :  { %3154 = vmatpush3.bf16.msra.mxu0 %v3153_v1  ;;  %v4036_v1 = vld [vmem:[#allocation2 + $0x1b0] sm:$0xff]  ;;  %v4859_v30 = vand.u32 4294901760, %v4093_v50 }
  0x73   :  { %3156 = vmatprep.subr.bf16.mxu0 %v3155_v10  ;;  %3114 = vmatpush3.bf16.msra.mxu1 %v4939_v34  ;;  %v4952_v10 = vld [vmem:[#allocation15_spill] sm:$0xff]  ;;  %4954 = vst [vmem:[#allocation10_spill] sm:$0xff] %v4056_v12  ;;  %v4842_v31 = vand.u32 4294901760, %v4036_v1 }
  0x74   :  { %3116 = vmatprep.subr.bf16.mxu1 %v4940_v42 }
  0x76   :  { %3158 = vmatpush3.bf16.msra.mxu0 %v3157_v47  ;;  %v4837_v47 = vand.u32 4294901760, %v4033_v3 }
  0x77   :  { %3160 = vmatprep.subr.bf16.mxu0 %v3159_v5  ;;  %3118 = vmatpush3.bf16.msra.mxu1 %v4944_v55  ;;  %v4841_v5 = vand.u32 4294901760, %v4038_v32 }
  0x78   :  { %3120 = vmatprep.subr.bf16.mxu1 %v4945_v18  ;;  %v4075_v7 = vpack.c.bf16 %v4837_v47, %v4838_v35  ;;  %v4090_v47 = vld [vmem:[#allocation2 + $0x148] sm:$0xff]  ;;  %v4959_v35 = vld [vmem:[#allocation18_spill] sm:$0xff] }
  0x79   :  { %v4084_v63 = vpack.c.bf16 %v4841_v5, %v4842_v31  ;;  %v4855_v31 = vand.u32 4294901760, %v4088_v60  ;;  %v4854_v45 = vand.u32 4294901760, %v4090_v47 }
  0x7a   :  { %3162 = vmatpush3.bf16.msra.mxu0 %v3161_v53  ;;  %v4955_v53 = vld [vmem:[#allocation16_spill] sm:$0xff]  ;;  %4957 = vst [vmem:[#allocation11_spill] sm:$0xff] %v4075_v7 }
  0x7b   :  { %3164 = vmatprep.subr.bf16.mxu0 %v3163_v8  ;;  %3122 = vmatpush3.bf16.msra.mxu1 %v4948_v13  ;;  %v4956_v8 = vld [vmem:[#allocation17_spill] sm:$0xff]  ;;  %4958 = vst [vmem:[#allocation12_spill] sm:$0xff] %v4084_v63 }
  0x7c   :  { %3124 = vmatprep.subr.bf16.mxu1 %v4949_v39 }
  0x7e   :  { %3166 = vmatpush3.bf16.msra.mxu0 %v3165_v16  ;;  %v4846_v16 = vand.u32 4294901760, %v4062_v52 }
  0x7f   :  { %3200 = vmatprep.subr.bf16.mxu0 %v3996_v26  ;;  %3126 = vmatpush3.bf16.msra.mxu1 %v4951_v4 }
  0x80   :  { %3128 = vmatprep.subr.bf16.mxu1 %v4952_v10  ;;  %v4103_v5 = vpack.c.bf16 %v4846_v16, %v4847_v54  ;;  %v4858_v16 = vand.u32 4294901760, %v4095_v46  ;;  %v4118_v54 = vld [vmem:[#allocation2 + $0x150] sm:$0xff] }
  0x81   :  { %880 = vmatmul.mubr.f32.vlgmr.msra.gmra.mrb[2].mxu0 %v3685_v0 }
  0x82   :  { %3202 = vmatpush3.bf16.msra.mxu0 %v4015_v11  ;;  %1090 = vmatprep.mubr.f32.mxu0 %v1089_v9  ;;  %v4850_v9 = vand.u32 4294901760, %v4065_v51  ;;  %4960 = vst [vmem:[#allocation13_spill] sm:$0xff] %v4103_v5 }
  0x83   :  { %3204 = vmatprep.subr.bf16.mxu0 %v4027_v49  ;;  %3130 = vmatpush3.bf16.msra.mxu1 %v4955_v53 }
  0x84   :  { %3132 = vmatprep.subr.bf16.mxu1 %v4956_v8 }
  0x86   :  { %3206 = vmatpush3.bf16.msra.mxu0 %v4047_v36 }
  0x87   :  { %3208 = vmatprep.subr.bf16.mxu0 %v4056_v12  ;;  %3134 = vmatpush3.bf16.msra.mxu1 %v4959_v35 }
  0x88   :  { %3168 = vmatprep.subr.bf16.mxu1 %v3591_v15  ;;  %v4114_v15 = vpack.c.bf16 %v4849_v38, %v4850_v9  ;;  %v4130_v38 = vand.u32 4294901760, %v3951_v33  ;;  %v4137_v9 = vpack.c.bf16 %v4854_v45, %v4855_v31  ;;  %v4152_v45 = vld [vmem:[#allocation2 + $0x168] sm:$0xff]  ;;  %v4155_v31 = vld [vmem:[#allocation2 + $0x1f0] sm:$0xff] }
  0x8a   :  { %3210 = vmatpush3.bf16.msra.mxu0 %v4075_v7  ;;  %712 = vmatmul.mubr.f32.vlgmr.msra.gmra.mrb[4].mxu1 %v4961_v20  ;;  %4962 = vst [vmem:[#allocation14_spill] sm:$0xff] %v4114_v15  ;;  %v4125_v20 = vld [vmem:[#allocation2 + $0x1e8] sm:$0xff]  ;;  %4963 = vst [vmem:[#allocation15_spill] sm:$0xff] %v4137_v9  ;;  %v4976_v7 = vand.u32 4294901760, %v3978_v6 }
  0x8b   :  { %3212 = vmatprep.subr.bf16.mxu0 %v4084_v63  ;;  %3170 = vmatpush3.bf16.msra.mxu1 %v3597_v21  ;;  %v4965_v21 = vand.u32 4294901760, %v3954_v40  ;;  %v4207_v63 = vld [vmem:[#allocation2 + $0x170] sm:$0xff] }
  0x8c   :  { %982 = vmatprep.mubr.f32.mxu1 %v3702_v25  ;;  %3172 = vmatprep.subr.bf16.mxu1 %v3603_v24  ;;  %v4146_v24 = vpack.c.bf16 %v4858_v16, %v4859_v30  ;;  %v4966_v16 = vand.u32 4294901760, %v3956_v48  ;;  %v4172_v25 = vsub.f32 %v3971_v57, %v4967_v56  ;;  %v1026_v56 = vand.u32 4294901760, %v4150_v19 }
  0x8e   :  { %3214 = vmatpush3.bf16.msra.mxu0 %v4103_v5  ;;  %4964 = vst [vmem:[#allocation16_spill] sm:$0xff] %v4146_v24  ;;  %v4167_v30 = vsub.f32 %v3956_v48, %v4966_v16  ;;  %v4968_v5 = vand.u32 4294901760, %v3973_v28  ;;  %v4969_v48 = vand.u32 4294901760, %v4118_v54  ;;  %v4970_v16 = vand.u32 4294901760, %v4120_v22 }
  0x8f   :  { %3216 = vmatprep.subr.bf16.mxu0 %v4114_v15  ;;  %3174 = vmatpush3.bf16.msra.mxu1 %v3612_v37  ;;  %v4162_v15 = vsub.f32 %v3954_v40, %v4965_v21  ;;  %v4177_v37 = vsub.f32 %v3951_v33, %v4130_v38  ;;  %v4972_v33 = vand.u32 4294901760, %v3976_v14 }
  0x90   :  { %3176 = vmatprep.subr.bf16.mxu1 %v3618_v44  ;;  %v4182_v40 = vsub.f32 %v3973_v28, %v4968_v5  ;;  %v4189_v21 = vpack.c.bf16 %v4970_v16, %v4969_v48  ;;  %v4973_v28 = vand.u32 4294901760, %v4123_v27  ;;  %v4974_v5 = vand.u32 4294901760, %v4125_v20  ;;  %v4209_v44 = vld [vmem:[#allocation2 + $0x178] sm:$0xff] }
  0x91   :  { %v4196_v57 = vsub.f32 %v3976_v14, %v4972_v33  ;;  %v4214_v14 = vsub.f32 %v3978_v6, %v4976_v7  ;;  %v4977_v33 = vand.u32 4294901760, %v4000_v29  ;;  %v4979_v16 = vand.u32 4294901760, %v4005_v59 }
  0x92   :  { %3218 = vmatpush3.bf16.msra.mxu0 %v4137_v9  ;;  %4971 = vst [vmem:[#allocation17_spill] sm:$0xff] %v4189_v21  ;;  %v4203_v9 = vpack.c.bf16 %v4974_v5, %v4973_v28  ;;  %v4978_v28 = vand.u32 4294901760, %v4002_v58  ;;  %v4980_v6 = vand.u32 4294901760, %v4007_v41 }
  0x93   :  { %3220 = vmatprep.subr.bf16.mxu0 %v4146_v24  ;;  %v4219_v24 = vsub.f32 %v4000_v29, %v4977_v33  ;;  %3178 = vmatpush3.bf16.msra.mxu1 %v4939_v34  ;;  %v4230_v48 = vsub.f32 %v4005_v59, %v4979_v16  ;;  %v4981_v29 = vand.u32 4294901760, %v4031_v61  ;;  %v4983_v59 = vand.u32 4294901760, %v4036_v1 }
  0x94   :  { %4975 = vst [vmem:[#allocation18_spill] sm:$0xff] %v4203_v9  ;;  %v4224_v5 = vsub.f32 %v4002_v58, %v4978_v28  ;;  %v4235_v7 = vsub.f32 %v4007_v41, %v4980_v6  ;;  %v4982_v58 = vand.u32 4294901760, %v4033_v3  ;;  %3180 = vmatprep.subr.bf16.mxu1 %v4940_v42  ;;  %v4984_v41 = vand.u32 4294901760, %v4152_v45 }
  0x95   :  { %v4240_v33 = vsub.f32 %v4031_v61, %v4981_v29  ;;  %v4252_v16 = vsub.f32 %v4036_v1, %v4983_v59  ;;  %v4986_v29 = vand.u32 4294901760, %v4038_v32  ;;  %v4988_v59 = vand.u32 4294901760, %v4062_v52 }
  0x96   :  { %v4245_v28 = vsub.f32 %v4033_v3, %v4982_v58  ;;  %3222 = vmatpush3.bf16.msra.mxu0 %v4189_v21  ;;  %v4257_v61 = vpack.c.bf16 %v4984_v41, %v1026_v56  ;;  %v4987_v58 = vand.u32 4294901760, %v4060_v43  ;;  %v4989_v41 = vand.u32 4294901760, %v4155_v31 }
  0x97   :  { %v4264_v42 = vsub.f32 %v4038_v32, %v4986_v29  ;;  %v4274_v34 = vsub.f32 %v4062_v52, %v4988_v59  ;;  %3224 = vmatprep.subr.bf16.mxu0 %v4203_v9  ;;  %v4990_v3 = vand.u32 4294901760, %v4157_v17  ;;  %3182 = vmatpush3.bf16.msra.mxu1 %v4944_v55  ;;  %v4992_v32 = vand.u32 4294901760, %v4065_v51 }
  0x98   :  { %4985 = vst [vmem:[#allocation19_spill] sm:$0xff] %v4257_v61  ;;  %v4269_v1 = vsub.f32 %v4060_v43, %v4987_v58  ;;  %v4993_v29 = vand.u32 4294901760, %v4067_v2  ;;  %3184 = vmatprep.subr.bf16.mxu1 %v4945_v18  ;;  %v4997_v59 = vand.u32 4294901760, %v4093_v50  ;;  %v4998_v58 = vand.u32 4294901760, %v4095_v46 }
  0x99   :  { %v4281_v6 = vpack.c.bf16 %v4990_v3, %v4989_v41  ;;  %v4287_v43 = vsub.f32 %v4065_v51, %v4992_v32  ;;  %v4994_v3 = vand.u32 4294901760, %v4088_v60  ;;  %v4995_v41 = vand.u32 4294901760, %v4090_v47 }
  0x9a   :  { %v4292_v52 = vsub.f32 %v4067_v2, %v4993_v29  ;;  %v4996_v2 = vand.u32 4294901760, %v4177_v37  ;;  %v4314_v18 = vsub.f32 %v4093_v50, %v4997_v59  ;;  %3226 = vmatpush3.bf16.msra.mxu0 %v4257_v61  ;;  %v5002_v32 = vand.u32 4294901760, %v4118_v54 }
  0x9b   :  { %4991 = vst [vmem:[#allocation20_spill] sm:$0xff] %v4281_v6  ;;  %v4300_v55 = vsub.f32 %v4088_v60, %v4994_v3  ;;  %v4305_v51 = vsub.f32 %v4090_v47, %v4995_v41  ;;  %v4319_v60 = vsub.f32 %v4095_v46, %v4998_v58  ;;  %v4999_v47 = vand.u32 4294901760, %v4207_v63  ;;  %3228 = vmatprep.subr.bf16.mxu0 %v4281_v6 }
  0x9c   :  { %v1094_v29 = vsub.f32 %v4177_v37, %v4996_v2  ;;  %v5000_v3 = vand.u32 4294901760, %v4209_v44  ;;  %v4332_v50 = vsub.f32 %v4118_v54, %v5002_v32  ;;  %v3263_v46 = vpack.c.bf16 %v4167_v30, %v4162_v15  ;;  %3186 = vmatpush3.bf16.msra.mxu1 %v4948_v13 }
  0x9d   :  { %v5004_v2 = vand.u32 4294901760, %v4123_v27  ;;  %v5005_v32 = vand.u32 4294901760, %v4162_v15  ;;  %v5006_v58 = vand.u32 4294901760, %v4167_v30  ;;  %3188 = vmatprep.subr.bf16.mxu1 %v4949_v39  ;;  %v5007_v13 = vand.u32 4294901760, %v4125_v20 }
  0x9e   :  { %v4326_v41 = vpack.c.bf16 %v5000_v3, %v4999_v47  ;;  %v5003_v47 = vand.u32 4294901760, %v4120_v22  ;;  %v1095_v61 = vand.u32 4294901760, %v1094_v29  ;;  %v3265_v39 = vpack.c.bf16 %v4182_v40, %v4172_v25 }
  0x9f   :  { %v4348_v54 = vsub.f32 %v4123_v27, %v5004_v2  ;;  %v1217_v6 = vsub.f32 %v4162_v15, %v5005_v32  ;;  %v1224_v59 = vsub.f32 %v4167_v30, %v5006_v58  ;;  %v5008_v27 = vand.u32 4294901760, %v4172_v25 }
  0xa0   :  { %5001 = vst [vmem:[#allocation21_spill] sm:$0xff] %v4326_v41  ;;  %v4343_v3 = vsub.f32 %v4120_v22, %v5003_v47  ;;  %v4360_v22 = vsub.f32 %v4125_v20, %v5007_v13  ;;  %v4363_v47 = vsub.f32 %v4150_v19, %v1026_v56  ;;  %3230 = vmatpush3.bf16.msra.mxu0 %v4326_v41  ;;  %v5009_v32 = vand.u32 4294901760, %v4182_v40 }
  0xa1   :  { %v1105_v2 = vsub.f32 %v4172_v25, %v5008_v27  ;;  %3264 = vmatprep.subr.bf16.mxu0 %v3263_v46  ;;  %v5010_v19 = vand.u32 4294901760, %v4196_v57  ;;  %v5011_v29 = vand.u32 4294901760, %v4214_v14  ;;  %v3267_v41 = vpack.c.bf16 %v4214_v14, %v4196_v57  ;;  %3190 = vmatpush3.bf16.msra.mxu1 %v4951_v4 }
  0xa2   :  { %v1112_v58 = vsub.f32 %v4182_v40, %v5009_v32  ;;  %v5012_v20 = vand.u32 4294901760, %v4152_v45  ;;  %v1218_v46 = vand.u32 4294901760, %v1217_v6  ;;  %v1225_v9 = vand.u32 4294901760, %v1224_v59  ;;  %3192 = vmatprep.subr.bf16.mxu1 %v4952_v10 }
  0xa3   :  { %v1231_v56 = vsub.f32 %v4196_v57, %v5010_v19  ;;  %v1238_v27 = vsub.f32 %v4214_v14, %v5011_v29  ;;  %v4884_v19 = vand.u32 4294901760, %v4235_v7  ;;  %v5013_v29 = vand.u32 4294901760, %v4155_v31  ;;  %1096 = vmatmul.mubr.f32.vlgmr.msra.gmra.mrb[4].mxu0 %v1095_v61 }
  0xa4   :  { %v4389_v13 = vsub.f32 %v4152_v45, %v5012_v20  ;;  %v1106_v12 = vand.u32 4294901760, %v1105_v2  ;;  %v4885_v4 = vand.u32 4294901760, %v4240_v33  ;;  %v4888_v32 = vand.u32 4294901760, %v4245_v28  ;;  %3266 = vmatpush3.bf16.msra.mxu0 %v3265_v39  ;;  %1463 = vmatprep.mubr.f32.mxu0 %v3990_v23 }
  0xa5   :  { %v4396_v21 = vsub.f32 %v4155_v31, %v5013_v29  ;;  %v1113_v36 = vand.u32 4294901760, %v1112_v58  ;;  %v5014_v45 = vand.u32 4294901760, %v4219_v24  ;;  %v5015_v59 = vand.u32 4294901760, %v4224_v5  ;;  %3268 = vmatprep.subr.bf16.mxu0 %v3267_v41  ;;  %3194 = vmatpush3.bf16.msra.mxu1 %v4955_v53 }
  0xa6   :  { %v3269_v31 = vpack.c.bf16 %v4224_v5, %v4219_v24  ;;  %v1232_v61 = vand.u32 4294901760, %v1231_v56  ;;  %v1239_v2 = vand.u32 4294901760, %v1238_v27  ;;  %v5016_v20 = vand.u32 4294901760, %v4230_v48  ;;  %3196 = vmatprep.subr.bf16.mxu1 %v4956_v8 }
  0xa7   :  { %v1119_v6 = vsub.f32 %v4219_v24, %v5014_v45  ;;  %v1126_v10 = vsub.f32 %v4224_v5, %v5015_v59  ;;  %v3271_v39 = vpack.c.bf16 %v4235_v7, %v4230_v48  ;;  %v5017_v29 = vand.u32 4294901760, %v4157_v17 }
  0xa8   :  { %v1245_v58 = vsub.f32 %v4230_v48, %v5016_v20  ;;  %v5018_v59 = vand.u32 4294901760, %v4207_v63  ;;  %v3231_v41 = vpack.c.bf16 %v1225_v9, %v1218_v46  ;;  %v1252_v27 = vsub.f32 %v4235_v7, %v4884_v19  ;;  %3270 = vmatpush3.bf16.msra.mxu0 %v3269_v31 }
  0xa9   :  { %v4418_v45 = vsub.f32 %v4157_v17, %v5017_v29  ;;  %v1133_v53 = vsub.f32 %v4240_v33, %v4885_v4  ;;  %v1140_v17 = vsub.f32 %v4245_v28, %v4888_v32  ;;  %v4890_v20 = vand.u32 4294901760, %v4252_v16  ;;  %3272 = vmatprep.subr.bf16.mxu0 %v3271_v39  ;;  %3198 = vmatpush3.bf16.msra.mxu1 %v4959_v35 }
  0xaa   :  { %v4423_v56 = vsub.f32 %v4207_v63, %v5018_v59  ;;  %v3233_v29 = vpack.c.bf16 %v1113_v36, %v1106_v12  ;;  %v1120_v9 = vand.u32 4294901760, %v1119_v6  ;;  %v1127_v46 = vand.u32 4294901760, %v1126_v10  ;;  %3232 = vmatprep.subr.bf16.mxu1 %v3231_v41 }
  0xab   :  { %v3273_v59 = vpack.c.bf16 %v4245_v28, %v4240_v33  ;;  %v3235_v8 = vpack.c.bf16 %v1239_v2, %v1232_v61  ;;  %v1246_v19 = vand.u32 4294901760, %v1245_v58  ;;  %v4889_v4 = vand.u32 4294901760, %v4269_v1 }
  0xac   :  { %v3275_v49 = vpack.c.bf16 %v4264_v42, %v4252_v16  ;;  %v1253_v32 = vand.u32 4294901760, %v1252_v27  ;;  %v4892_v63 = vand.u32 4294901760, %v4274_v34  ;;  %v4891_v36 = vand.u32 4294901760, %v4287_v43  ;;  %984 = vmatmul.mubr.f32.vlgmr.msra.gmra.mrb[6].mxu1 %v3685_v0 }
  0xad   :  { %v4893_v12 = vand.u32 4294901760, %v4292_v52  ;;  %v1134_v6 = vand.u32 4294901760, %v1133_v53  ;;  %v1141_v10 = vand.u32 4294901760, %v1140_v17  ;;  %v1259_v31 = vsub.f32 %v4252_v16, %v4890_v20  ;;  %3274 = vmatpush3.bf16.msra.mxu0 %v3273_v59  ;;  %3234 = vmatpush3.bf16.msra.mxu1 %v3233_v29 }
  0xae   :  { %v5019_v61 = vand.u32 4294901760, %v4264_v42  ;;  %v3237_v58 = vpack.c.bf16 %v1127_v46, %v1120_v9  ;;  %v3277_v35 = vpack.c.bf16 %v4274_v34, %v4269_v1  ;;  %v4896_v39 = vand.u32 4294901760, %v4300_v55  ;;  %3276 = vmatprep.subr.bf16.mxu0 %v3275_v49  ;;  %1326 = vmatprep.mubr.f32.mxu1 %v3980_v62 }
  0xaf   :  { %v4894_v27 = vand.u32 4294901760, %v4305_v51  ;;  %v1147_v41 = vsub.f32 %v4269_v1, %v4889_v4  ;;  %v3279_v53 = vpack.c.bf16 %v4292_v52, %v4287_v43  ;;  %v4895_v17 = vand.u32 4294901760, %v4314_v18  ;;  %3236 = vmatprep.subr.bf16.mxu1 %v3235_v8 }
  0xb0   :  { %v1266_v2 = vsub.f32 %v4264_v42, %v5019_v61  ;;  %v4897_v9 = vand.u32 4294901760, %v4319_v60  ;;  %v1154_v46 = vsub.f32 %v4274_v34, %v4892_v63  ;;  %v1273_v0 = vsub.f32 %v4287_v43, %v4891_v36 }
  0xb1   :  { %v1280_v49 = vsub.f32 %v4292_v52, %v4893_v12  ;;  %v3239_v59 = vpack.c.bf16 %v1253_v32, %v1246_v19  ;;  %v3241_v61 = vpack.c.bf16 %v1141_v10, %v1134_v6  ;;  %v1260_v4 = vand.u32 4294901760, %v1259_v31  ;;  %3278 = vmatpush3.bf16.msra.mxu0 %v3277_v35  ;;  %3238 = vmatpush3.bf16.msra.mxu1 %v3237_v58 }
  0xb2   :  { %v1267_v20 = vand.u32 4294901760, %v1266_v2  ;;  %v1161_v29 = vsub.f32 %v4300_v55, %v4896_v39  ;;  %v1168_v36 = vsub.f32 %v4305_v51, %v4894_v27  ;;  %v3281_v63 = vpack.c.bf16 %v4305_v51, %v4300_v55  ;;  %3280 = vmatprep.subr.bf16.mxu0 %v3279_v53 }
  0xb3   :  { %v1287_v32 = vsub.f32 %v4314_v18, %v4895_v17  ;;  %v1294_v19 = vsub.f32 %v4319_v60, %v4897_v9  ;;  %v3283_v6 = vpack.c.bf16 %v4319_v60, %v4314_v18  ;;  %v1148_v10 = vand.u32 4294901760, %v1147_v41  ;;  %3240 = vmatprep.subr.bf16.mxu1 %v3239_v59 }
  0xb4   :  { %v1155_v31 = vand.u32 4294901760, %v1154_v46  ;;  %v1274_v2 = vand.u32 4294901760, %v1273_v0  ;;  %v1281_v35 = vand.u32 4294901760, %v1280_v49  ;;  %v5020_v53 = vand.u32 4294901760, %v4209_v44 }
  0xb5   :  { %v3243_v17 = vpack.c.bf16 %v1267_v20, %v1260_v4  ;;  %v1300_v39 = vand.u32 4294901760, %v4348_v54  ;;  %v1307_v9 = vand.u32 4294901760, %v4360_v22  ;;  %v1162_v8 = vand.u32 4294901760, %v1161_v29  ;;  %3282 = vmatpush3.bf16.msra.mxu0 %v3281_v63  ;;  %3242 = vmatpush3.bf16.msra.mxu1 %v3241_v61 }
  0xb6   :  { %v4495_v27 = vsub.f32 %v4209_v44, %v5020_v53  ;;  %v1169_v12 = vand.u32 4294901760, %v1168_v36  ;;  %v5021_v58 = vand.u32 4294901760, %v4332_v50  ;;  %v3285_v46 = vpack.c.bf16 %v4343_v3, %v4332_v50  ;;  %3284 = vmatprep.subr.bf16.mxu0 %v3283_v6 }
  0xb7   :  { %v1288_v0 = vand.u32 4294901760, %v1287_v32  ;;  %v1295_v49 = vand.u32 4294901760, %v1294_v19  ;;  %v5022_v44 = vand.u32 4294901760, %v4343_v3  ;;  %v3287_v20 = vpack.c.bf16 %v4360_v22, %v4348_v54  ;;  %3244 = vmatprep.subr.bf16.mxu1 %v3243_v17 }
  0xb8   :  { %v1175_v41 = vsub.f32 %v4332_v50, %v5021_v58  ;;  %v3245_v36 = vpack.c.bf16 %v1155_v31, %v1148_v10  ;;  %v3247_v63 = vpack.c.bf16 %v1281_v35, %v1274_v2  ;;  %v1188_v59 = vand.u32 4294901760, %v4363_v47 }
  0xb9   :  { %v1182_v4 = vsub.f32 %v4343_v3, %v5022_v44  ;;  %v4898_v29 = vand.u32 4294901760, %v4389_v13  ;;  %v1301_v32 = vsub.f32 %v4348_v54, %v1300_v39  ;;  %v1308_v19 = vsub.f32 %v4360_v22, %v1307_v9  ;;  %3286 = vmatpush3.bf16.msra.mxu0 %v3285_v46  ;;  %v5056_v54 = vld [vmem:[#allocation13_spill] sm:$0xff]  ;;  %v5057_v22 = vld [vmem:[#allocation14_spill] sm:$0xff] }
  0xba   :  { %v4899_v6 = vand.u32 4294901760, %v4396_v21  ;;  %v4900_v53 = vand.u32 4294901760, %v4418_v45  ;;  %v3249_v61 = vpack.c.bf16 %v1169_v12, %v1162_v8  ;;  %v3289_v10 = vpack.c.bf16 %v4389_v13, %v4363_v47  ;;  %3288 = vmatprep.subr.bf16.mxu0 %v3287_v20  ;;  %3246 = vmatpush3.bf16.msra.mxu1 %v3245_v36 }
  0xbb   :  { %v3251_v31 = vpack.c.bf16 %v1295_v49, %v1288_v0  ;;  %v1176_v2 = vand.u32 4294901760, %v1175_v41  ;;  %v1183_v17 = vand.u32 4294901760, %v1182_v4  ;;  %v3291_v35 = vpack.c.bf16 %v4418_v45, %v4396_v21  ;;  %3248 = vmatprep.subr.bf16.mxu1 %v3247_v63 }
  0xbc   :  { %v1189_v58 = vsub.f32 %v4363_v47, %v1188_v59  ;;  %v1196_v12 = vsub.f32 %v4389_v13, %v4898_v29  ;;  %v1202_v8 = vand.u32 4294901760, %v4423_v56  ;;  %v4901_v46 = vand.u32 4294901760, %v4495_v27  ;;  %v5059_v47 = vld [vmem:[#allocation15_spill] sm:$0xff] }
  0xbd   :  { %v1302_v41 = vand.u32 4294901760, %v1301_v32  ;;  %v1309_v0 = vand.u32 4294901760, %v1308_v19  ;;  %v1315_v49 = vsub.f32 %v4396_v21, %v4899_v6  ;;  %v1322_v44 = vsub.f32 %v4418_v45, %v4900_v53  ;;  %3290 = vmatpush3.bf16.msra.mxu0 %v3289_v10 }
  0xbe   :  { %v3293_v4 = vpack.c.bf16 %v4495_v27, %v4423_v56  ;;  %v3253_v20 = vpack.c.bf16 %v1183_v17, %v1176_v2  ;;  %3292 = vmatprep.subr.bf16.mxu0 %v3291_v35  ;;  %v5023_v36 = vand.u32 4294901760, %v4162_v15  ;;  %v5024_v63 = vand.u32 4294901760, %v4167_v30  ;;  %3250 = vmatpush3.bf16.msra.mxu1 %v3249_v61 }
  0xbf   :  { %v1190_v19 = vand.u32 4294901760, %v1189_v58  ;;  %v1197_v29 = vand.u32 4294901760, %v1196_v12  ;;  %v1203_v6 = vsub.f32 %v4423_v56, %v1202_v8  ;;  %v1210_v10 = vsub.f32 %v4495_v27, %v4901_v46  ;;  %3252 = vmatprep.subr.bf16.mxu1 %v3251_v31  ;;  %v5065_v56 = vld [vmem:[#allocation21_spill] sm:$0xff] }
  0xc0   :  { %v3327_v32 = vpack.c.bf16 %v5024_v63, %v5023_v36  ;;  %v3255_v53 = vpack.c.bf16 %v1309_v0, %v1302_v41  ;;  %v1316_v2 = vand.u32 4294901760, %v1315_v49  ;;  %v1323_v17 = vand.u32 4294901760, %v1322_v44 }
  0xc1   :  { %3294 = vmatpush3.bf16.msra.mxu0 %v3293_v4  ;;  %v5025_v15 = vand.u32 4294901760, %v4172_v25  ;;  %v5026_v30 = vand.u32 4294901760, %v4182_v40  ;;  %v5027_v35 = vand.u32 4294901760, %v4196_v57  ;;  %v5028_v58 = vand.u32 4294901760, %v4214_v14  ;;  %v5042_v4 = vld [vmem:[#allocation8_spill] sm:$0xff] }
  0xc2   :  { %3328 = vmatprep.subr.bf16.mxu0 %v3327_v32  ;;  %3254 = vmatpush3.bf16.msra.mxu1 %v3253_v20  ;;  %v3257_v36 = vpack.c.bf16 %v1197_v29, %v1190_v19  ;;  %v1204_v63 = vand.u32 4294901760, %v1203_v6  ;;  %v1211_v46 = vand.u32 4294901760, %v1210_v10  ;;  %v3259_v31 = vpack.c.bf16 %v1323_v17, %v1316_v2  ;;  %v5047_v19 = vld [vmem:[#allocation9_spill] sm:$0xff]  ;;  %v5048_v10 = vld [vmem:[#allocation10_spill] sm:$0xff] }
  0xc3   :  { %v3329_v61 = vpack.c.bf16 %v5026_v30, %v5025_v15  ;;  %v3331_v12 = vpack.c.bf16 %v5028_v58, %v5027_v35  ;;  %3256 = vmatprep.subr.bf16.mxu1 %v3255_v53  ;;  %v5029_v25 = vand.u32 4294901760, %v4219_v24  ;;  %v5030_v40 = vand.u32 4294901760, %v4224_v5  ;;  %v2417_v58 = vld [vmem:[%s4777_s2] ss:$0 sm:$0xff] }
  0xc4   :  { %1466 = vmatmul.mubr.f32.vlgmr.msra.gmra.mrb[6].mxu0 %v4177_v37  ;;  %v5031_v57 = vand.u32 4294901760, %v4230_v48  ;;  %v5032_v14 = vand.u32 4294901760, %v4235_v7  ;;  %v3261_v6 = vpack.c.bf16 %v1211_v46, %v1204_v63  ;;  %v5033_v53 = vand.u32 4294901760, %v4240_v33 }
  0xc5   :  { %3330 = vmatpush3.bf16.msra.mxu0 %v3329_v61  ;;  %v3333_v41 = vpack.c.bf16 %v5030_v40, %v5029_v25  ;;  %1740 = vmatprep.mubr.f32.mxu0 %v3980_v62  ;;  %v5034_v0 = vand.u32 4294901760, %v4245_v28  ;;  %v5035_v5 = vand.u32 4294901760, %v4252_v16  ;;  %v5036_v49 = vand.u32 4294901760, %v4264_v42  ;;  %v5064_v61 = vld [vmem:[#allocation20_spill] sm:$0xff] }
  0xc6   :  { %3332 = vmatprep.subr.bf16.mxu0 %v3331_v12  ;;  %v3335_v29 = vpack.c.bf16 %v5032_v14, %v5031_v57  ;;  %3258 = vmatpush3.bf16.msra.mxu1 %v3257_v36  ;;  %v5037_v48 = vand.u32 4294901760, %v4269_v1  ;;  %v5038_v7 = vand.u32 4294901760, %v4274_v34  ;;  %v5039_v33 = vand.u32 4294901760, %v4287_v43  ;;  %v1855_v57 = vld [vmem:[#allocation4 + $0x8] sm:$0xff] }
  0xc7   :  { %3260 = vmatprep.subr.bf16.mxu1 %v3259_v31  ;;  %v3337_v24 = vpack.c.bf16 %v5034_v0, %v5033_v53  ;;  %v3339_v44 = vpack.c.bf16 %v5036_v49, %v5035_v5  ;;  %v5040_v28 = vand.u32 4294901760, %v4292_v52  ;;  %v5041_v42 = vand.u32 4294901760, %v3990_v23 }
  0xc8   :  { %v3341_v46 = vpack.c.bf16 %v5038_v7, %v5037_v48  ;;  %v5043_v1 = vand.u32 4294901760, %v4300_v55  ;;  %v5044_v34 = vand.u32 4294901760, %v4305_v51  ;;  %v5045_v32 = vand.u32 4294901760, %v4314_v18  ;;  %v5051_v51 = vld [vmem:[#allocation11_spill] sm:$0xff]  ;;  %v5052_v18 = vld [vmem:[#allocation12_spill] sm:$0xff] }
  0xc9   :  { %3334 = vmatpush3.bf16.msra.mxu0 %v3333_v41  ;;  %v3343_v16 = vpack.c.bf16 %v5040_v28, %v5039_v33  ;;  %v5046_v43 = vand.u32 4294901760, %v4319_v60  ;;  %v5049_v23 = vand.u32 4294901760, %v4332_v50  ;;  %v5050_v2 = vand.u32 4294901760, %v4343_v3  ;;  %v1854_v41 = vld [vmem:[#allocation4] sm:$0xff]  ;;  %v1857_v33 = vld [vmem:[#allocation4 + $0x18] sm:$0xff] }
  0xca   :  { %3336 = vmatprep.subr.bf16.mxu0 %v3335_v29  ;;  %3262 = vmatpush3.bf16.msra.mxu1 %v3261_v6  ;;  %v3345_v20 = vpack.c.bf16 %v5044_v34, %v5043_v1  ;;  %v3351_v55 = vpack.c.bf16 %v1307_v9, %v1300_v39  ;;  %v5053_v60 = vand.u32 4294901760, %v4389_v13  ;;  %v5054_v50 = vand.u32 4294901760, %v4396_v21  ;;  %v5060_v13 = vld [vmem:[#allocation16_spill] sm:$0xff]  ;;  %v5061_v21 = vld [vmem:[#allocation17_spill] sm:$0xff] }
  0xcb   :  { %3296 = vmatprep.subr.bf16.mxu1 %v3996_v26  ;;  %v3347_v52 = vpack.c.bf16 %v5046_v43, %v5045_v32  ;;  %v3349_v17 = vpack.c.bf16 %v5050_v2, %v5049_v23  ;;  %v5055_v3 = vand.u32 4294901760, %v4418_v45  ;;  %v5058_v39 = vand.u32 4294901760, %v4495_v27  ;;  %v5062_v45 = vld [vmem:[#allocation18_spill] sm:$0xff]  ;;  %v1859_v32 = vld [vmem:[#allocation4 + $0x28] sm:$0xff] }
  0xcc   :  { %v3353_v15 = vpack.c.bf16 %v5053_v60, %v1188_v59  ;;  %v5063_v59 = vld [vmem:[#allocation19_spill] sm:$0xff]  ;;  %v5066_v27 = vand.u32 4294901760, %v4177_v37  ;;  %v1874_v14 = vand.u32 4294901760, %v1854_v41  ;;  %v1877_v29 = vand.u32 4294901760, %v1855_v57 }
  0xcd   :  { %3338 = vmatpush3.bf16.msra.mxu0 %v3337_v24  ;;  %1328 = vmatmul.mubr.f32.vlgmr.msra.gmra.mrb[8].mxu1 %v4130_v38  ;;  %v3355_v30 = vpack.c.bf16 %v5055_v3, %v5054_v50  ;;  %v3357_v9 = vpack.c.bf16 %v5058_v39, %v1202_v8  ;;  %v1889_v23 = vand.u32 4294901760, %v1859_v32  ;;  %v1861_v60 = vld [vmem:[#allocation4 + $0x38] sm:$0xff] }
  0xce   :  { %3340 = vmatprep.subr.bf16.mxu0 %v3339_v44  ;;  %3298 = vmatpush3.bf16.msra.mxu1 %v4015_v11  ;;  %v4658_v6 = vsub.f32 %v1854_v41, %v1874_v14  ;;  %v4660_v53 = vsub.f32 %v1855_v57, %v1877_v29  ;;  %v3536_v41 = vmov 0.0  }
  0xcf   :  { %1570 = vmatprep.mubr.f32.mxu1 %v5041_v42  ;;  %3300 = vmatprep.subr.bf16.mxu1 %v5042_v4 }
  0xd0   :  { %v1959_v0 = vand.u32 4294901760, %v4658_v6  ;;  %v1966_v24 = vand.u32 4294901760, %v4660_v53 }
  0xd1   :  { %3342 = vmatpush3.bf16.msra.mxu0 %v3341_v46  ;;  %v1856_v46 = vld [vmem:[#allocation4 + $0x10] sm:$0xff] }
  0xd2   :  { %3344 = vmatprep.subr.bf16.mxu0 %v3343_v16  ;;  %3302 = vmatpush3.bf16.msra.mxu1 %v5047_v19  ;;  %v1960_v5 = vsub.f32 %v4658_v6, %v1959_v0  ;;  %v1967_v49 = vsub.f32 %v4660_v53, %v1966_v24  ;;  %v1880_v28 = vand.u32 4294901760, %v1856_v46  ;;  %v1883_v16 = vand.u32 4294901760, %v1857_v33 }
  0xd3   :  { %3304 = vmatprep.subr.bf16.mxu1 %v5048_v10 }
  0xd4   :  { %v1961_v44 = vand.u32 4294901760, %v1960_v5  ;;  %v1968_v48 = vand.u32 4294901760, %v1967_v49  ;;  %v4673_v1 = vsub.f32 %v1857_v33, %v1883_v16 }
  0xd5   :  { %3346 = vmatpush3.bf16.msra.mxu0 %v3345_v20  ;;  %v1858_v20 = vld [vmem:[#allocation4 + $0x20] sm:$0xff] }
  0xd6   :  { %3348 = vmatprep.subr.bf16.mxu0 %v3347_v52  ;;  %3306 = vmatpush3.bf16.msra.mxu1 %v5051_v51  ;;  %v3404_v7 = vpack.c.bf16 %v1968_v48, %v1961_v44 }
  0xd7   :  { %3308 = vmatprep.subr.bf16.mxu1 %v5052_v18 }
  0xd9   :  { %3350 = vmatpush3.bf16.msra.mxu0 %v3349_v17 }
  0xda   :  { %3352 = vmatprep.subr.bf16.mxu0 %v3351_v55  ;;  %3310 = vmatpush3.bf16.msra.mxu1 %v5056_v54 }
  0xdb   :  { %3312 = vmatprep.subr.bf16.mxu1 %v5057_v22 }
  0xdd   :  { %3354 = vmatpush3.bf16.msra.mxu0 %v3353_v15 }
  0xde   :  { %3356 = vmatprep.subr.bf16.mxu0 %v3355_v30  ;;  %3314 = vmatpush3.bf16.msra.mxu1 %v5059_v47 }
  0xdf   :  { %3316 = vmatprep.subr.bf16.mxu1 %v5060_v13 }
  0xe1   :  { %3358 = vmatpush3.bf16.msra.mxu0 %v3357_v9 }
  0xe2   :  { %3318 = vmatpush3.bf16.msra.mxu1 %v5061_v21 }
  0xe3   :  { %3320 = vmatprep.subr.bf16.mxu1 %v5062_v45 }
  0xe4   :  { %1742 = vmatmul.mubr.f32.vlgmr.msra.gmra.mrb[8].mxu0 %v4130_v38 }
  0xe5   :  { %2928 = vmatprep.mubr.msk.f32.mxu0 %vm3535_vm0, %v3536_v41 }
  0xe6   :  { %3322 = vmatpush3.bf16.msra.mxu1 %v5063_v59 }
  0xe7   :  { %3324 = vmatprep.subr.bf16.mxu1 %v5064_v61 }
  0xea   :  { %3326 = vmatpush3.bf16.msra.mxu1 %v5065_v56 }
  0xeb   :  { %3360 = vmatprep.subr.bf16.mxu1 %v3996_v26 }
  0xed   :  { %1574 = vmatmul.mubr.f32.vlgmr.msra.gmra.mrb[10].mxu1 %v5066_v27 }
  0xee   :  { %3362 = vmatpush3.bf16.msra.mxu1 %v4015_v11  ;;  %1844 = vmatprep.mubr.f32.mxu1 %v3980_v62 }
  0xef   :  { %3364 = vmatprep.subr.bf16.mxu1 %v5042_v4  ;;  %v4671_v4 = vsub.f32 %v1856_v46, %v1880_v28 }
  0xf1   :  { %v1973_v52 = vand.u32 4294901760, %v4671_v4 }
  0xf2   :  { %3366 = vmatpush3.bf16.msra.mxu1 %v5047_v19  ;;  %v1980_v19 = vand.u32 4294901760, %v4673_v1 }
  0xf3   :  { %3368 = vmatprep.subr.bf16.mxu1 %v5048_v10  ;;  %v1886_v10 = vand.u32 4294901760, %v1858_v20  ;;  %v1974_v2 = vsub.f32 %v4671_v4, %v1973_v52 }
  0xf4   :  { %v1981_v17 = vsub.f32 %v4673_v1, %v1980_v19 }
  0xf5   :  { %v4683_v55 = vsub.f32 %v1858_v20, %v1886_v10  ;;  %v1975_v15 = vand.u32 4294901760, %v1974_v2  ;;  %v4717_v57 = vpack.c.bf16 %v1889_v23, %v1886_v10  ;;  %v3443_v20 = vpack.c.bf16 %v1980_v19, %v1973_v52 }
  0xf6   :  { %3370 = vmatpush3.bf16.msra.mxu1 %v5051_v51  ;;  %v4685_v51 = vsub.f32 %v1859_v32, %v1889_v23  ;;  %v1982_v50 = vand.u32 4294901760, %v1981_v17 }
  0xf7   :  { %3372 = vmatprep.subr.bf16.mxu1 %v5052_v18  ;;  %v1860_v18 = vld [vmem:[#allocation4 + $0x30] sm:$0xff]  ;;  %v1987_v3 = vand.u32 4294901760, %v4683_v55 }
  0xf8   :  { %v1892_v30 = vand.u32 4294901760, %v1860_v18  ;;  %v3407_v39 = vpack.c.bf16 %v1982_v50, %v1975_v15  ;;  %v3422_v5 = vpack.c.bf16 %v4685_v51, %v4683_v55 }
  0xf9   :  { %v1988_v9 = vsub.f32 %v4683_v55, %v1987_v3 }
  0xfa   :  { %3374 = vmatpush3.bf16.msra.mxu1 %v5056_v54  ;;  %v1994_v54 = vand.u32 4294901760, %v4685_v51 }
  0xfb   :  { %3376 = vmatprep.subr.bf16.mxu1 %v5057_v22  ;;  %v1895_v22 = vand.u32 4294901760, %v1861_v60 }
  0xfc   :  { %v3446_v32 = vpack.c.bf16 %v1994_v54, %v1987_v3 }
  0xfe   :  { %3378 = vmatpush3.bf16.msra.mxu1 %v5059_v47  ;;  %v4690_v47 = vsub.f32 %v1860_v18, %v1892_v30 }
  0xff   :  { %3380 = vmatprep.subr.bf16.mxu1 %v5060_v13  ;;  %v1995_v13 = vsub.f32 %v4685_v51, %v1994_v54 }
 0x101   :  { %v1996_v27 = vand.u32 4294901760, %v1995_v13 }
 0x102   :  { %3382 = vmatpush3.bf16.msra.mxu1 %v5061_v21  ;;  %v4693_v21 = vsub.f32 %v1861_v60, %v1895_v22 }
 0x103   :  { %3384 = vmatprep.subr.bf16.mxu1 %v5062_v45 }
 0x104   :  { %v3425_v44 = vpack.c.bf16 %v4693_v21, %v4690_v47 }
 0x106   :  { %3386 = vmatpush3.bf16.msra.mxu1 %v5063_v59  ;;  %v1989_v59 = vand.u32 4294901760, %v1988_v9 }
 0x107   :  { %3388 = vmatprep.subr.bf16.mxu1 %v5064_v61  ;;  %v2001_v61 = vand.u32 4294901760, %v4690_v47 }
 0x10a   :  { %3390 = vmatpush3.bf16.msra.mxu1 %v5065_v56 }
 0x10d   :  { %1846 = vmatmul.mubr.f32.vlgmr.msra.gmra.mrb[12].mxu1 %v4130_v38  ;;  %v3534_v38 = vmov 0.0|0.0  }
 0x10e   :  { %3403 = vmatprep.subr.bf16.mxu0 %v3534_v38  ;;  %3391 = vmatprep.subr.bf16.mxu1 %v3534_v38 }
 0x10f   :  { %3405 = vmatpush3.bf16.msra.mxu0 %v3404_v7  ;;  %2909 = vmatprep.mubr.msk.f32.mxu1 %vm3535_vm0, %v3536_v41 }
 0x110   :  { %3406 = vmatprep.subr.bf16.mxu0 %v3534_v38 }
 0x113   :  { %3408 = vmatpush3.bf16.msra.mxu0 %v3407_v39 }
 0x114   :  { %3409 = vmatprep.subr.bf16.mxu0 %v3534_v38 }
 0x11d   :  { %v2451_v62 = vpop.f32.mrb[0].mxu1 }
 0x11e   :  { %v2452_v26 = vpop.f32.mrb[1].mxu1 }
 0x11f   :  { %v2453_v11 = vadd.f32 %v2452_v26, %v2451_v62  ;;  %v2008_v62 = vand.u32 4294901760, %v4693_v21 }
 0x121   :  { %v236_v63 = vadd.f32 %v2453_v11, %v2417_v58  ;;  %v2002_v11 = vsub.f32 %v4690_v47, %v2001_v61  ;;  %v3449_v10 = vpack.c.bf16 %v2008_v62, %v2001_v61 }
 0x134   :  { %v2521_v37 = vpop.f32.mrb[0].mxu0 }
 0x135   :  { %v2522_v8 = vpop.f32.mrb[1].mxu0 }
 0x136   :  { %v2523_v35 = vadd.f32 %v2522_v8, %v2521_v37  ;;  %v3410_v37 = vpack.c.bf16 %v1996_v27, %v1989_v59  ;;  %v4699_v8 = vpack.c.bf16 %v1877_v29, %v1874_v14  ;;  %v3419_v14 = vpack.c.bf16 %v4673_v1, %v4671_v4 }
 0x137   :  { %v4723_v29 = vpack.c.bf16 %v1895_v22, %v1892_v30 }
 0x138   :  { %3411 = vmatpush3.bf16.msra.mxu0 %v3410_v37  ;;  %3393 = vmatpush3.bf16.msra.mxu1 %v4699_v8 }
 0x139   :  { %3412 = vmatprep.subr.bf16.mxu0 %v3534_v38  ;;  %3394 = vmatprep.subr.bf16.mxu1 %v3534_v38 }
 0x13d   :  { %v2486_v12 = vpop.f32.mrb[2].mxu1 }
 0x13e   :  { %v2487_v36 = vpop.f32.mrb[3].mxu1 }
 0x13f   :  { %v2488_v31 = vadd.f32 %v2487_v36, %v2486_v12  ;;  %v2003_v12 = vand.u32 4294901760, %v2002_v11 }
 0x141   :  { %v468_v25 = vadd.f32 %v2488_v31, %v236_v63 }
 0x143   :  { %v4654_v40 = vadd.f32 %v2523_v35, %v468_v25  ;;  %v2009_v35 = vsub.f32 %v4693_v21, %v2008_v62  ;;  %v4706_v25 = vpack.c.bf16 %v1883_v16, %v1880_v28 }
 0x145   :  { %v2010_v36 = vand.u32 4294901760, %v2009_v35  ;;  %3396 = vmatpush3.bf16.msra.mxu1 %v4706_v25 }
 0x146   :  { %3397 = vmatprep.subr.bf16.mxu1 %v3534_v38 }
 0x147   :  { %v3413_v31 = vpack.c.bf16 %v2010_v36, %v2003_v12 }
 0x149   :  { %3414 = vmatpush3.bf16.msra.mxu0 %v3413_v31  ;;  %3399 = vmatpush3.bf16.msra.mxu1 %v4717_v57 }
 0x14a   :  { %3415 = vmatprep.subr.bf16.mxu0 %v3534_v38  ;;  %3400 = vmatprep.subr.bf16.mxu1 %v3534_v38 }
 0x14d   :  { %3402 = vmatpush3.bf16.msra.mxu1 %v4723_v29 }
 0x154   :  { %v2591_v42 = vpop.f32.mrb[2].mxu0 }
 0x155   :  { %v2592_v34 = vpop.f32.mrb[3].mxu0 }
 0x156   :  { %v2593_v43 = vadd.f32 %v2592_v34, %v2591_v42  ;;  %v3440_v34 = vpack.c.bf16 %v1966_v24, %v1959_v0 }
 0x15d   :  { %v2556_v45 = vpop.f32.mrb[4].mxu1 }
 0x15e   :  { %v2557_v56 = vpop.f32.mrb[5].mxu1 }
 0x15f   :  { %v2558_v26 = vadd.f32 %v2557_v56, %v2556_v45  ;;  %v2418_v56 = vld [vmem:[%s4779_s4] ss:$0 sm:$0xff] }
 0x161   :  { %v714_v58 = vadd.f32 %v2558_v26, %v4654_v40  ;;  %v3416_v40 = vpack.c.bf16 %v4660_v53, %v4658_v6 }
 0x163   :  { %v882_v63 = vadd.f32 %v2593_v43, %v714_v58 }
 0x176   :  { %v2661_v49 = vpop.f32.mrb[4].mxu0 }
 0x177   :  { %v2662_v48 = vpop.f32.mrb[5].mxu0 }
 0x178   :  { %v2663_v7 = vadd.f32 %v2662_v48, %v2661_v49 }
 0x17f   :  { %v2626_v46 = vpop.f32.mrb[6].mxu1 }
 0x180   :  { %v2627_v33 = vpop.f32.mrb[7].mxu1 }
 0x181   :  { %v2628_v28 = vadd.f32 %v2627_v33, %v2626_v46 }
 0x183   :  { %v986_v16 = vadd.f32 %v2628_v28, %v882_v63 }
 0x185   :  { %v1098_v42 = vadd.f32 %v2663_v7, %v986_v16 }
 0x197   :  { %v2731_v43 = vpop.f32.mrb[6].mxu0 }
 0x198   :  { %v2732_v23 = vpop.f32.mrb[7].mxu0 }
 0x199   :  { %v2733_v2 = vadd.f32 %v2732_v23, %v2731_v43 }
 0x1a0   :  { %v2696_v17 = vpop.f32.mrb[8].mxu1 }
 0x1a1   :  { %v2697_v55 = vpop.f32.mrb[9].mxu1 }
 0x1a2   :  { %v2698_v51 = vadd.f32 %v2697_v55, %v2696_v17 }
 0x1a4   :  { %v1330_v18 = vadd.f32 %v2698_v51, %v1098_v42 }
 0x1a6   :  { %v1468_v60 = vadd.f32 %v2733_v2, %v1330_v18 }
 0x1b7   :  { %v2801_v15 = vpop.f32.mrb[8].mxu0 }
 0x1b8   :  { %v2802_v6 = vpop.f32.mrb[9].mxu0 }
 0x1b9   :  { %v2803_v50 = vadd.f32 %v2802_v6, %v2801_v15 }
 0x1c0   :  { %v2766_v53 = vpop.f32.mrb[10].mxu1 }
 0x1c1   :  { %v2767_v0 = vpop.f32.mrb[11].mxu1 }
 0x1c2   :  { %v2768_v24 = vadd.f32 %v2767_v0, %v2766_v53 }
 0x1c4   :  { %v1576_v4 = vadd.f32 %v2768_v24, %v1468_v60 }
 0x1c6   :  { %v1744_v30 = vadd.f32 %v2803_v50, %v1576_v4 }
 0x1e0   :  { %v2836_v1 = vpop.f32.mrb[12].mxu1 }
 0x1e1   :  { %v2837_v52 = vpop.f32.mrb[13].mxu1 }
 0x1e2   :  { %v2838_v19 = vadd.f32 %v2837_v52, %v2836_v1 }
 0x1e4   :  { %v1848_v3 = vadd.f32 %v2838_v19, %v1744_v30 }
 0x1e6   :  { %vm1851_vm1 = vcmp.gt.f32.partialorder %v1848_v3, 0.0  ;;  %v1852_v54 = vmul.f32 0.01, %v1848_v3 }
 0x1e8   :  { %v1853_v22 = vsel %vm1851_vm1, %v1848_v3, %v1852_v54 }
 0x1e9   :  { %v1871_v39 = vsel %vm1869_vm2, %v1853_v22, 0 }
 0x1ea   :  { %v1946_v9 = vand.u32 4294901760, %v1871_v39 }
 0x1ec   :  { %2929 = vmatmul.mubr.f32.vlgmr.msra.gmra.mrb[10].mxu0 %v1946_v9  ;;  %v1947_v47 = vsub.f32 %v1871_v39, %v1946_v9 }
 0x1ed   :  { %3417 = vmatpush3.bf16.msra.mxu0 %v3416_v40  ;;  %2947 = vmatprep.mubr.msk.f32.mxu0 %vm3535_vm0, %v3536_v41 }
 0x1ee   :  { %3418 = vmatprep.subr.bf16.mxu0 %v3534_v38  ;;  %v1948_v13 = vand.u32 4294901760, %v1947_v47 }
 0x1f0   :  { %v1949_v21 = vsub.f32 %v1947_v47, %v1948_v13 }
 0x1f1   :  { %3420 = vmatpush3.bf16.msra.mxu0 %v3419_v14 }
 0x1f2   :  { %3421 = vmatprep.subr.bf16.mxu0 %v3534_v38  ;;  %v1950_v45 = vand.u32 4294901760, %v1949_v21 }
 0x1f4   :  { %2910 = vmatmul.mubr.f32.vlgmr.msra.gmra.mrb[14].mxu1 %v1950_v45 }
 0x1f5   :  { %3423 = vmatpush3.bf16.msra.mxu0 %v3422_v5 }
 0x1f6   :  { %3424 = vmatprep.subr.bf16.mxu0 %v3534_v38 }
 0x1f9   :  { %3426 = vmatpush3.bf16.msra.mxu0 %v3425_v44 }
 0x1fa   :  { %3427 = vmatprep.subr.bf16.mxu0 %v3534_v38 }
 0x1fc   :  { %2948 = vmatmul.mubr.f32.vlgmr.msra.gmra.mrb[10].mxu0 %v1947_v47 }
 0x1fd   :  { %3429 = vmatpush3.bf16.msra.mxu0 %v4699_v8  ;;  %2966 = vmatprep.mubr.msk.f32.mxu0 %vm3535_vm0, %v3536_v41 }
 0x1fe   :  { %3430 = vmatprep.subr.bf16.mxu0 %v3534_v38 }
 0x201   :  { %3432 = vmatpush3.bf16.msra.mxu0 %v4706_v25 }
 0x202   :  { %3433 = vmatprep.subr.bf16.mxu0 %v3534_v38 }
 0x205   :  { %3435 = vmatpush3.bf16.msra.mxu0 %v4717_v57 }
 0x206   :  { %3436 = vmatprep.subr.bf16.mxu0 %v3534_v38 }
 0x209   :  { %3438 = vmatpush3.bf16.msra.mxu0 %v4723_v29 }
 0x20a   :  { %3439 = vmatprep.subr.bf16.mxu0 %v3534_v38 }
 0x20c   :  { %2967 = vmatmul.mubr.f32.vlgmr.msra.gmra.mrb[10].mxu0 %v1948_v13 }
 0x20d   :  { %3441 = vmatpush3.bf16.msra.mxu0 %v3440_v34  ;;  %2985 = vmatprep.mubr.msk.f32.mxu0 %vm3535_vm0, %v3536_v41 }
 0x20e   :  { %3442 = vmatprep.subr.bf16.mxu0 %v3534_v38 }
 0x211   :  { %3444 = vmatpush3.bf16.msra.mxu0 %v3443_v20 }
 0x212   :  { %3445 = vmatprep.subr.bf16.mxu0 %v3534_v38 }
 0x215   :  { %3447 = vmatpush3.bf16.msra.mxu0 %v3446_v32 }
 0x216   :  { %3448 = vmatprep.subr.bf16.mxu0 %v3534_v38 }
 0x219   :  { %3450 = vmatpush3.bf16.msra.mxu0 %v3449_v10 }
 0x21a   :  { %3451 = vmatprep.subr.bf16.mxu0 %v3534_v38 }
 0x21c   :  { %2986 = vmatmul.mubr.f32.vlgmr.msra.gmra.mrb[10].mxu0 %v1946_v9 }
 0x21d   :  { %3453 = vmatpush3.bf16.msra.mxu0 %v4699_v8  ;;  %3004 = vmatprep.mubr.msk.f32.mxu0 %vm3535_vm0, %v3536_v41 }
 0x21e   :  { %3454 = vmatprep.subr.bf16.mxu0 %v3534_v38 }
 0x221   :  { %3456 = vmatpush3.bf16.msra.mxu0 %v4706_v25 }
 0x222   :  { %3457 = vmatprep.subr.bf16.mxu0 %v3534_v38 }
 0x225   :  { %3459 = vmatpush3.bf16.msra.mxu0 %v4717_v57 }
 0x226   :  { %3460 = vmatprep.subr.bf16.mxu0 %v3534_v38 }
 0x229   :  { %3462 = vmatpush3.bf16.msra.mxu0 %v4723_v29 }
 0x22c   :  { %3005 = vmatmul.mubr.f32.vlgmr.msra.gmra.mrb[10].mxu0 %v1946_v9 }
 0x2c7   :  { %v1952_v59 = vpop.f32.mrb[14].mxu1 }
 0x2c8   :  { %v2911_v61 = vpop.f32.mrb[15].mxu1  ;;  %v1953_v27 = vadd.f32 %v2418_v56, %v1952_v59 }
 0x2ff   :  { %v2406_v62 = vpop.f32.mrb[10].mxu0 }
 0x300   :  { %v3464_v26 = vadd.f32 %v2406_v62, %v1953_v27  ;;  %v3006_v11 = vpop.f32.mrb[11].mxu0 }
 0x302   :  { %2410 = vst [vmem:[%s4780_s5] sm:$0xf] %v3464_v26 }
 0x303   :  { %2415 = vsyncpa [#allocation3], 1 }
 0x304   :  { %2416 = vsyncpa [#allocation5], 1 }

</bundles_post_ra>
